<compile_context>
chip_gen: v5e
topology: v5e:2x2
jax: 0.10.0
libtpu: 0.0.40
codegen_flags: <defaults>
</compile_context>

<pallas_src>
import numpy as np

import jax
import jax.numpy as jnp
from jax.experimental import pallas as pl
from jax.experimental.pallas import tpu as pltpu

BN_EPS = 1e-5
N_PAD = 8                       # sublane-aligned row padding for the fc output
VMEM_LIMIT = 32 * 1024 * 1024


def _round_up(x, m):
    return (x + m - 1) // m * m


# ------------------------------ Pallas kernel -------------------------------

def _encoder_kernel(lhs1_ref, w1_ref, bn1_ref,
                    g2_ref, w2_ref, bn2_ref,
                    g3_ref, w3_ref, bn3_ref,
                    gfc_ref, wfc_ref, bfc_ref,
                    o_ref):
    """Whole encoder forward in one kernel (everything VMEM resident).

    lhs1: (M1, K1)    wrapper-side im2col of the input (tap-major, real K)
    wK:   (taps*C, O) tap-major packed conv / fc weights
    bnK:  (2, O)      row 0 = gamma, row 1 = beta (f32)
    gK:   (taps*Mout, Min) 0/1 gather matrices implementing pad-1/stride-2
                      im2col row selection (zero rows = padding positions)
    o:    (N_PAD, latent) f32
    """

    def bn_relu(acc, bn_ref):
        # Training-mode BatchNorm over all rows; two-pass (shifted) variance.
        bn = bn_ref[...]
        mean = jnp.mean(acc, axis=0, keepdims=True)
        cen = acc - mean
        var = jnp.mean(cen * cen, axis=0, keepdims=True)
        xhat = cen * jax.lax.rsqrt(var + BN_EPS)
        y = xhat * bn[0:1, :] + bn[1:2, :]
        return jnp.maximum(y, 0.0).astype(jnp.bfloat16)

    def gathered_matmul(src, g_ref, w_ref, taps):
        """out[m, o] = sum_t (G_t @ src) @ W_t  (conv as im2col-by-matmul).

        The gather matmul copies bf16 activations exactly (0/1 weights), so it
        adds no numerical error.  Per-tap accumulation keeps the body to plain
        2-D dots on aligned row blocks; see scaling TODO at top for the
        single long-K variant.
        """
        cin = src.shape[1]
        m_out = g_ref.shape[0] // taps
        o_out = w_ref.shape[1]
        gathered = jnp.dot(g_ref[...], src,
                           preferred_element_type=jnp.float32)
        gathered = gathered.astype(jnp.bfloat16)
        acc = jnp.zeros((m_out, o_out), jnp.float32)
        for t in range(taps):
            acc = acc + jnp.dot(gathered[t * m_out:(t + 1) * m_out, :],
                                w_ref[t * cin:(t + 1) * cin, :],
                                preferred_element_type=jnp.float32)
        return acc

    # Stage 1: single matmul over the wrapper-built im2col (K = 9*C_in real).
    y1 = bn_relu(jnp.dot(lhs1_ref[...], w1_ref[...],
                         preferred_element_type=jnp.float32), bn1_ref)
    # Stages 2 / 3: 3x3 stride-2 conv + BN + ReLU, VMEM resident.
    y2 = bn_relu(gathered_matmul(y1, g2_ref, w2_ref, 9), bn2_ref)
    y3 = bn_relu(gathered_matmul(y2, g3_ref, w3_ref, 9), bn3_ref)
    # fc_mu as a "4-tap" gathered matmul over the 2x2 spatial positions
    # (matches the PyTorch NCHW flatten + Linear); no BN / ReLU.
    fc_taps = gfc_ref.shape[0] // o_ref.shape[0]
    z = gathered_matmul(y3, gfc_ref, wfc_ref, fc_taps)
    o_ref[...] = z + bfc_ref[...]


def _full_spec(shape):
    zeros = (0,) * len(shape)
    return pl.BlockSpec(shape, lambda i: zeros)


# --------------------------- one-time param packing -------------------------

def _make_conv_gather(n, h, w):
    """Row-gather matrix for a 3x3, stride-2, pad-1 conv on an (n, h, w)
    raster: row (t*Mout + m_out) selects the input pixel read by output pixel
    m_out at tap t (all-zero row where the tap falls in the zero padding)."""
    oh, ow = h // 2, w // 2
    m_in, m_out = n * h * w, n * oh * ow
    g = np.zeros((9 * m_out, m_in), np.float32)
    for t in range(9):
        kh, kw = divmod(t, 3)
        for b in range(n):
            for i in range(oh):
                r = 2 * i + kh - 1
                if not (0 <= r < h):
                    continue
                for j in range(ow):
                    c = 2 * j + kw - 1
                    if 0 <= c < w:
                        g[t * m_out + (b * oh + i) * ow + j,
                          (b * h + r) * w + c] = 1.0
    return g


def _make_fc_gather(n, spatial, n_pad):
    """Permutation gathering (n, spatial) rows into spatial-major blocks of
    n_pad rows each (rows >= n are zero padding)."""
    g = np.zeros((spatial * n_pad, n * spatial), np.float32)
    for s in range(spatial):
        for b in range(n):
            g[s * n_pad + b, b * spatial + s] = 1.0
    return g


def pack_params(conv_params, fc_w, fc_b, batch, imsize):
    """Hoisted out of the jitted forward: run once at init time."""
    assert len(conv_params) == 3, "kernel is wired for 3 conv stages"
    packed = {}
    for s, (w, _cb, gamma, beta) in enumerate(conv_params, start=1):
        o, c, _, _ = w.shape
        wk = jnp.transpose(w, (2, 3, 1, 0)).reshape(9 * c, o)   # (t, c) rows
        if s == 1:
            k1 = _round_up(9 * c, 32)        # small bf16 sublane-pair pad only
            wk = jnp.pad(wk, ((0, k1 - 9 * c), (0, 0)))
        packed[f"w{s}"] = wk.astype(jnp.bfloat16)
        packed[f"bn{s}"] = jnp.stack([gamma, beta], axis=0).astype(jnp.float32)

    h1, h2, h3 = imsize // 2, imsize // 4, imsize // 8
    packed["g2"] = jnp.asarray(_make_conv_gather(batch, h1, h1), jnp.bfloat16)
    packed["g3"] = jnp.asarray(_make_conv_gather(batch, h2, h2), jnp.bfloat16)

    latent, feat = fc_w.shape
    c3 = conv_params[-1][0].shape[0]
    assert feat == c3 * h3 * h3
    wfc = fc_w.reshape(latent, c3, h3, h3)
    wfc = jnp.transpose(wfc, (2, 3, 1, 0)).reshape(h3 * h3 * c3, latent)
    packed["wfc"] = wfc.astype(jnp.bfloat16)
    packed["bfc"] = fc_b.reshape(1, latent).astype(jnp.float32)
    packed["gfc"] = jnp.asarray(_make_fc_gather(batch, h3 * h3, N_PAD),
                                jnp.bfloat16)
    return packed


# --------------------------------- forward ----------------------------------

def encoder_forward(x, packed):
    """Conv/BN/ReLU stack -> flatten -> fc, all heavy math in ONE pallas_call.
    Only per-call XLA work: the tiny stage-1 im2col and the final row slice."""
    n, c_in, h, w = x.shape
    oh, ow = h // 2, w // 2

    # Stage-1 im2col in the wrapper (C_in=3 -> the 9x expansion is ~28 KiB).
    xp = jnp.pad(x, ((0, 0), (0, 0), (1, 1), (1, 1)))
    taps = [xp[:, :, kh:kh + h:2, kw:kw + w:2]
            for kh in range(3) for kw in range(3)]              # 9 x (N,C,OH,OW)
    lhs1 = jnp.transpose(jnp.stack(taps, axis=0), (1, 3, 4, 0, 2))
    lhs1 = lhs1.reshape(n * oh * ow, 9 * c_in)
    k1 = packed["w1"].shape[0]
    lhs1 = jnp.pad(lhs1, ((0, 0), (0, k1 - 9 * c_in))).astype(jnp.bfloat16)

    latent = packed["wfc"].shape[1]
    args = (lhs1, packed["w1"], packed["bn1"],
            packed["g2"], packed["w2"], packed["bn2"],
            packed["g3"], packed["w3"], packed["bn3"],
            packed["gfc"], packed["wfc"], packed["bfc"])

    z = pl.pallas_call(
        _encoder_kernel,
        out_shape=jax.ShapeDtypeStruct((N_PAD, latent), jnp.float32),
        grid=(1,),
        in_specs=[_full_spec(a.shape) for a in args],
        out_specs=_full_spec((N_PAD, latent)),
        compiler_params=pltpu.CompilerParams(
            dimension_semantics=("arbitrary",),
            vmem_limit_bytes=VMEM_LIMIT),
    )(*args)
    return z[:n]


# -------------------------------- reference ---------------------------------

def reference_forward(x, conv_params, fc_w, fc_b):
    """Pure-JAX reference (conv bias kept; bf16-quantized at the same points
    as the kernel path: bf16 operands, f32 accumulation / BN)."""
    h = x
    for (w, cb, g, b) in conv_params:
        h = jax.lax.conv_general_dilated(
            h.astype(jnp.bfloat16), w.astype(jnp.bfloat16),
            window_strides=(2, 2), padding=((1, 1), (1, 1)),
            dimension_numbers=("NCHW", "OIHW", "NCHW"),
            preferred_element_type=jnp.float32)
        h = h + cb[None, :, None, None]
        mean = h.mean(axis=(0, 2, 3), keepdims=True)
        var = ((h - mean) ** 2).mean(axis=(0, 2, 3), keepdims=True)
        h = (h - mean) * jax.lax.rsqrt(var + BN_EPS)
        h = h * g[None, :, None, None] + b[None, :, None, None]
        h = jnp.maximum(h, 0.0).astype(jnp.bfloat16)
    flat = h.reshape(h.shape[0], -1)
    z = jnp.dot(flat, fc_w.T.astype(jnp.bfloat16),
                preferred_element_type=jnp.float32) + fc_b[None, :]
    return z


# ----------------------------------- main ------------------------------------

if __name__ == "__main__":
    batch, in_channels, imsize = 2, 3, 16
    hidden_dims = [16, 32, 64]
    latent_dim = 32
    outsize = imsize // (2 ** len(hidden_dims))

    key = jax.random.PRNGKey(0)
    keys = iter(jax.random.split(key, 4 * len(hidden_dims) + 3))

    conv_params = []
    c_in = in_channels
    for h_dim in hidden_dims:
        w = jax.random.normal(next(keys), (h_dim, c_in, 3, 3), jnp.float32) * 0.1
        cb = jax.random.normal(next(keys), (h_dim,), jnp.float32) * 0.1
        gamma = 1.0 + 0.1 * jax.random.normal(next(keys), (h_dim,), jnp.float32)
        beta = 0.1 * jax.random.normal(next(keys), (h_dim,), jnp.float32)
        conv_params.append((w, cb, gamma, beta))
        c_in = h_dim

    feat = hidden_dims[-1] * outsize * outsize
    fc_w = jax.random.normal(next(keys), (latent_dim, feat), jnp.float32) * 0.05
    fc_b = jax.random.normal(next(keys), (latent_dim,), jnp.float32) * 0.05

    x = jax.random.normal(next(keys), (batch, in_channels, imsize, imsize),
                          jnp.float32)

    # One-time packing (gather matrices, tap-major weights, BN params) -- kept
    # out of the per-call jitted forward per the review.
    packed = pack_params(conv_params, fc_w, fc_b, batch, imsize)

    forward = jax.jit(encoder_forward)
    z = forward(x, packed)
    z = jax.block_until_ready(z)

    z_ref = reference_forward(x, conv_params, fc_w, fc_b)
    assert z.shape == (batch, latent_dim)
    assert jnp.allclose(z, z_ref, atol=2e-2, rtol=2e-2), "mismatch vs reference"

    print("KERNEL_OK")
</pallas_src>

<mosaic_0001>
module attributes {stable_mosaic.version = 11 : i64} {
  func.func @_encoder_kernel(%arg0: i32, %arg1: memref<128x32xbf16, #tpu.memory_space<vmem>>, %arg2: memref<32x16xbf16, #tpu.memory_space<vmem>>, %arg3: memref<2x16xf32, #tpu.memory_space<vmem>>, %arg4: memref<288x128xbf16, #tpu.memory_space<vmem>>, %arg5: memref<144x32xbf16, #tpu.memory_space<vmem>>, %arg6: memref<2x32xf32, #tpu.memory_space<vmem>>, %arg7: memref<72x32xbf16, #tpu.memory_space<vmem>>, %arg8: memref<288x64xbf16, #tpu.memory_space<vmem>>, %arg9: memref<2x64xf32, #tpu.memory_space<vmem>>, %arg10: memref<32x8xbf16, #tpu.memory_space<vmem>>, %arg11: memref<256x32xbf16, #tpu.memory_space<vmem>>, %arg12: memref<1x32xf32, #tpu.memory_space<vmem>>, %arg13: memref<8x32xf32, #tpu.memory_space<vmem>>) attributes {dimension_semantics = [#tpu.dimension_semantics<arbitrary>], iteration_bounds = array<i64: 1>, scalar_prefetch = 0 : i64, scratch_operands = 0 : i64, tpu.core_type = #tpu.core_type<tc>, window_params = [{pipeline_mode = #tpu.pipeline_mode<synchronous>, transform_indices = @transform_0, window_bounds = array<i64: 128, 32>}, {pipeline_mode = #tpu.pipeline_mode<synchronous>, transform_indices = @transform_1, window_bounds = array<i64: 32, 16>}, {pipeline_mode = #tpu.pipeline_mode<synchronous>, transform_indices = @transform_2, window_bounds = array<i64: 2, 16>}, {pipeline_mode = #tpu.pipeline_mode<synchronous>, transform_indices = @transform_3, window_bounds = array<i64: 288, 128>}, {pipeline_mode = #tpu.pipeline_mode<synchronous>, transform_indices = @transform_4, window_bounds = array<i64: 144, 32>}, {pipeline_mode = #tpu.pipeline_mode<synchronous>, transform_indices = @transform_5, window_bounds = array<i64: 2, 32>}, {pipeline_mode = #tpu.pipeline_mode<synchronous>, transform_indices = @transform_6, window_bounds = array<i64: 72, 32>}, {pipeline_mode = #tpu.pipeline_mode<synchronous>, transform_indices = @transform_7, window_bounds = array<i64: 288, 64>}, {pipeline_mode = #tpu.pipeline_mode<synchronous>, transform_indices = @transform_8, window_bounds = array<i64: 2, 64>}, {pipeline_mode = #tpu.pipeline_mode<synchronous>, transform_indices = @transform_9, window_bounds = array<i64: 32, 8>}, {pipeline_mode = #tpu.pipeline_mode<synchronous>, transform_indices = @transform_10, window_bounds = array<i64: 256, 32>}, {pipeline_mode = #tpu.pipeline_mode<synchronous>, transform_indices = @transform_11, window_bounds = array<i64: 1, 32>}, {pipeline_mode = #tpu.pipeline_mode<synchronous>, transform_indices = @transform_12, window_bounds = array<i64: 8, 32>}]} {
    %c0 = arith.constant 0 : index
    %c0_0 = arith.constant 0 : index
    %0 = vector.load %arg1[%c0, %c0_0] : memref<128x32xbf16, #tpu.memory_space<vmem>>, vector<128x32xbf16>
    %c0_1 = arith.constant 0 : index
    %c0_2 = arith.constant 0 : index
    %1 = vector.load %arg2[%c0_1, %c0_2] : memref<32x16xbf16, #tpu.memory_space<vmem>>, vector<32x16xbf16>
    %cst = arith.constant dense<0.000000e+00> : vector<128x16xf32>
    %2 = tpu.matmul %0, %1, %cst {dimension_numbers = #tpu.dot_dimension_numbers<[1], [0], [0], [1], [0, 0, 1, 1], [], []>} : vector<128x32xbf16>, vector<32x16xbf16>, vector<128x16xf32> -> vector<128x16xf32>
    %c0_3 = arith.constant 0 : index
    %c0_4 = arith.constant 0 : index
    %3 = vector.load %arg3[%c0_3, %c0_4] : memref<2x16xf32, #tpu.memory_space<vmem>>, vector<2x16xf32>
    %cst_5 = arith.constant dense<0.000000e+00> : vector<16xf32>
    %4 = vector.multi_reduction <add>, %2, %cst_5 [0] : vector<128x16xf32> to vector<16xf32>
    %5 = vector.shape_cast %4 : vector<16xf32> to vector<1x16xf32>
    %cst_6 = arith.constant 1.280000e+02 : f32
    %6 = vector.broadcast %cst_6 : f32 to vector<1x16xf32>
    %7 = arith.divf %5, %6 : vector<1x16xf32>
    %8 = vector.broadcast %7 : vector<1x16xf32> to vector<128x16xf32>
    %9 = arith.subf %2, %8 : vector<128x16xf32>
    %10 = arith.mulf %9, %9 : vector<128x16xf32>
    %cst_7 = arith.constant dense<0.000000e+00> : vector<16xf32>
    %11 = vector.multi_reduction <add>, %10, %cst_7 [0] : vector<128x16xf32> to vector<16xf32>
    %12 = vector.shape_cast %11 : vector<16xf32> to vector<1x16xf32>
    %cst_8 = arith.constant 1.280000e+02 : f32
    %13 = vector.broadcast %cst_8 : f32 to vector<1x16xf32>
    %14 = arith.divf %12, %13 : vector<1x16xf32>
    %cst_9 = arith.constant 9.99999974E-6 : f32
    %15 = vector.broadcast %cst_9 : f32 to vector<1x16xf32>
    %16 = arith.addf %14, %15 : vector<1x16xf32>
    %17 = math.rsqrt %16 : vector<1x16xf32>
    %18 = vector.broadcast %17 : vector<1x16xf32> to vector<128x16xf32>
    %19 = arith.mulf %9, %18 : vector<128x16xf32>
    %20 = vector.extract_strided_slice %3 {offsets = [0, 0], sizes = [1, 16], strides = [1, 1]} : vector<2x16xf32> to vector<1x16xf32>
    %21 = vector.broadcast %20 : vector<1x16xf32> to vector<128x16xf32>
    %22 = arith.mulf %19, %21 : vector<128x16xf32>
    %23 = vector.extract_strided_slice %3 {offsets = [1, 0], sizes = [1, 16], strides = [1, 1]} : vector<2x16xf32> to vector<1x16xf32>
    %24 = vector.broadcast %23 : vector<1x16xf32> to vector<128x16xf32>
    %25 = arith.addf %22, %24 : vector<128x16xf32>
    %cst_10 = arith.constant 0.000000e+00 : f32
    %26 = vector.broadcast %cst_10 : f32 to vector<128x16xf32>
    %27 = arith.maximumf %25, %26 : vector<128x16xf32>
    %28 = arith.truncf %27 : vector<128x16xf32> to vector<128x16xbf16>
    %c0_11 = arith.constant 0 : index
    %c0_12 = arith.constant 0 : index
    %29 = vector.load %arg4[%c0_11, %c0_12] : memref<288x128xbf16, #tpu.memory_space<vmem>>, vector<288x128xbf16>
    %cst_13 = arith.constant dense<0.000000e+00> : vector<288x16xf32>
    %30 = tpu.matmul %29, %28, %cst_13 {dimension_numbers = #tpu.dot_dimension_numbers<[1], [0], [0], [1], [0, 0, 1, 1], [], []>} : vector<288x128xbf16>, vector<128x16xbf16>, vector<288x16xf32> -> vector<288x16xf32>
    %31 = arith.truncf %30 : vector<288x16xf32> to vector<288x16xbf16>
    %cst_14 = arith.constant 0.000000e+00 : f32
    %32 = vector.broadcast %cst_14 : f32 to vector<32x32xf32>
    %33 = vector.extract_strided_slice %31 {offsets = [0, 0], sizes = [32, 16], strides = [1, 1]} : vector<288x16xbf16> to vector<32x16xbf16>
    %c0_15 = arith.constant 0 : index
    %c0_16 = arith.constant 0 : index
    %34 = vector.load %arg5[%c0_15, %c0_16] : memref<144x32xbf16, #tpu.memory_space<vmem>>, vector<16x32xbf16>
    %cst_17 = arith.constant dense<0.000000e+00> : vector<32x32xf32>
    %35 = tpu.matmul %33, %34, %cst_17 {dimension_numbers = #tpu.dot_dimension_numbers<[1], [0], [0], [1], [0, 0, 1, 1], [], []>} : vector<32x16xbf16>, vector<16x32xbf16>, vector<32x32xf32> -> vector<32x32xf32>
    %36 = arith.addf %32, %35 : vector<32x32xf32>
    %37 = vector.extract_strided_slice %31 {offsets = [32, 0], sizes = [32, 16], strides = [1, 1]} : vector<288x16xbf16> to vector<32x16xbf16>
    %c16 = arith.constant 16 : index
    %c0_18 = arith.constant 0 : index
    %38 = vector.load %arg5[%c16, %c0_18] : memref<144x32xbf16, #tpu.memory_space<vmem>>, vector<16x32xbf16>
    %cst_19 = arith.constant dense<0.000000e+00> : vector<32x32xf32>
    %39 = tpu.matmul %37, %38, %cst_19 {dimension_numbers = #tpu.dot_dimension_numbers<[1], [0], [0], [1], [0, 0, 1, 1], [], []>} : vector<32x16xbf16>, vector<16x32xbf16>, vector<32x32xf32> -> vector<32x32xf32>
    %40 = arith.addf %36, %39 : vector<32x32xf32>
    %41 = vector.extract_strided_slice %31 {offsets = [64, 0], sizes = [32, 16], strides = [1, 1]} : vector<288x16xbf16> to vector<32x16xbf16>
    %c32 = arith.constant 32 : index
    %c0_20 = arith.constant 0 : index
    %42 = vector.load %arg5[%c32, %c0_20] : memref<144x32xbf16, #tpu.memory_space<vmem>>, vector<16x32xbf16>
    %cst_21 = arith.constant dense<0.000000e+00> : vector<32x32xf32>
    %43 = tpu.matmul %41, %42, %cst_21 {dimension_numbers = #tpu.dot_dimension_numbers<[1], [0], [0], [1], [0, 0, 1, 1], [], []>} : vector<32x16xbf16>, vector<16x32xbf16>, vector<32x32xf32> -> vector<32x32xf32>
    %44 = arith.addf %40, %43 : vector<32x32xf32>
    %45 = vector.extract_strided_slice %31 {offsets = [96, 0], sizes = [32, 16], strides = [1, 1]} : vector<288x16xbf16> to vector<32x16xbf16>
    %c48 = arith.constant 48 : index
    %c0_22 = arith.constant 0 : index
    %46 = vector.load %arg5[%c48, %c0_22] : memref<144x32xbf16, #tpu.memory_space<vmem>>, vector<16x32xbf16>
    %cst_23 = arith.constant dense<0.000000e+00> : vector<32x32xf32>
    %47 = tpu.matmul %45, %46, %cst_23 {dimension_numbers = #tpu.dot_dimension_numbers<[1], [0], [0], [1], [0, 0, 1, 1], [], []>} : vector<32x16xbf16>, vector<16x32xbf16>, vector<32x32xf32> -> vector<32x32xf32>
    %48 = arith.addf %44, %47 : vector<32x32xf32>
    %49 = vector.extract_strided_slice %31 {offsets = [128, 0], sizes = [32, 16], strides = [1, 1]} : vector<288x16xbf16> to vector<32x16xbf16>
    %c64 = arith.constant 64 : index
    %c0_24 = arith.constant 0 : index
    %50 = vector.load %arg5[%c64, %c0_24] : memref<144x32xbf16, #tpu.memory_space<vmem>>, vector<16x32xbf16>
    %cst_25 = arith.constant dense<0.000000e+00> : vector<32x32xf32>
    %51 = tpu.matmul %49, %50, %cst_25 {dimension_numbers = #tpu.dot_dimension_numbers<[1], [0], [0], [1], [0, 0, 1, 1], [], []>} : vector<32x16xbf16>, vector<16x32xbf16>, vector<32x32xf32> -> vector<32x32xf32>
    %52 = arith.addf %48, %51 : vector<32x32xf32>
    %53 = vector.extract_strided_slice %31 {offsets = [160, 0], sizes = [32, 16], strides = [1, 1]} : vector<288x16xbf16> to vector<32x16xbf16>
    %c80 = arith.constant 80 : index
    %c0_26 = arith.constant 0 : index
    %54 = vector.load %arg5[%c80, %c0_26] : memref<144x32xbf16, #tpu.memory_space<vmem>>, vector<16x32xbf16>
    %cst_27 = arith.constant dense<0.000000e+00> : vector<32x32xf32>
    %55 = tpu.matmul %53, %54, %cst_27 {dimension_numbers = #tpu.dot_dimension_numbers<[1], [0], [0], [1], [0, 0, 1, 1], [], []>} : vector<32x16xbf16>, vector<16x32xbf16>, vector<32x32xf32> -> vector<32x32xf32>
    %56 = arith.addf %52, %55 : vector<32x32xf32>
    %57 = vector.extract_strided_slice %31 {offsets = [192, 0], sizes = [32, 16], strides = [1, 1]} : vector<288x16xbf16> to vector<32x16xbf16>
    %c96 = arith.constant 96 : index
    %c0_28 = arith.constant 0 : index
    %58 = vector.load %arg5[%c96, %c0_28] : memref<144x32xbf16, #tpu.memory_space<vmem>>, vector<16x32xbf16>
    %cst_29 = arith.constant dense<0.000000e+00> : vector<32x32xf32>
    %59 = tpu.matmul %57, %58, %cst_29 {dimension_numbers = #tpu.dot_dimension_numbers<[1], [0], [0], [1], [0, 0, 1, 1], [], []>} : vector<32x16xbf16>, vector<16x32xbf16>, vector<32x32xf32> -> vector<32x32xf32>
    %60 = arith.addf %56, %59 : vector<32x32xf32>
    %61 = vector.extract_strided_slice %31 {offsets = [224, 0], sizes = [32, 16], strides = [1, 1]} : vector<288x16xbf16> to vector<32x16xbf16>
    %c112 = arith.constant 112 : index
    %c0_30 = arith.constant 0 : index
    %62 = vector.load %arg5[%c112, %c0_30] : memref<144x32xbf16, #tpu.memory_space<vmem>>, vector<16x32xbf16>
    %cst_31 = arith.constant dense<0.000000e+00> : vector<32x32xf32>
    %63 = tpu.matmul %61, %62, %cst_31 {dimension_numbers = #tpu.dot_dimension_numbers<[1], [0], [0], [1], [0, 0, 1, 1], [], []>} : vector<32x16xbf16>, vector<16x32xbf16>, vector<32x32xf32> -> vector<32x32xf32>
    %64 = arith.addf %60, %63 : vector<32x32xf32>
    %65 = vector.extract_strided_slice %31 {offsets = [256, 0], sizes = [32, 16], strides = [1, 1]} : vector<288x16xbf16> to vector<32x16xbf16>
    %c128 = arith.constant 128 : index
    %c0_32 = arith.constant 0 : index
    %66 = vector.load %arg5[%c128, %c0_32] : memref<144x32xbf16, #tpu.memory_space<vmem>>, vector<16x32xbf16>
    %cst_33 = arith.constant dense<0.000000e+00> : vector<32x32xf32>
    %67 = tpu.matmul %65, %66, %cst_33 {dimension_numbers = #tpu.dot_dimension_numbers<[1], [0], [0], [1], [0, 0, 1, 1], [], []>} : vector<32x16xbf16>, vector<16x32xbf16>, vector<32x32xf32> -> vector<32x32xf32>
    %68 = arith.addf %64, %67 : vector<32x32xf32>
    %c0_34 = arith.constant 0 : index
    %c0_35 = arith.constant 0 : index
    %69 = vector.load %arg6[%c0_34, %c0_35] : memref<2x32xf32, #tpu.memory_space<vmem>>, vector<2x32xf32>
    %cst_36 = arith.constant dense<0.000000e+00> : vector<32xf32>
    %70 = vector.multi_reduction <add>, %68, %cst_36 [0] : vector<32x32xf32> to vector<32xf32>
    %71 = vector.shape_cast %70 : vector<32xf32> to vector<1x32xf32>
    %cst_37 = arith.constant 3.200000e+01 : f32
    %72 = vector.broadcast %cst_37 : f32 to vector<1x32xf32>
    %73 = arith.divf %71, %72 : vector<1x32xf32>
    %74 = vector.broadcast %73 : vector<1x32xf32> to vector<32x32xf32>
    %75 = arith.subf %68, %74 : vector<32x32xf32>
    %76 = arith.mulf %75, %75 : vector<32x32xf32>
    %cst_38 = arith.constant dense<0.000000e+00> : vector<32xf32>
    %77 = vector.multi_reduction <add>, %76, %cst_38 [0] : vector<32x32xf32> to vector<32xf32>
    %78 = vector.shape_cast %77 : vector<32xf32> to vector<1x32xf32>
    %cst_39 = arith.constant 3.200000e+01 : f32
    %79 = vector.broadcast %cst_39 : f32 to vector<1x32xf32>
    %80 = arith.divf %78, %79 : vector<1x32xf32>
    %cst_40 = arith.constant 9.99999974E-6 : f32
    %81 = vector.broadcast %cst_40 : f32 to vector<1x32xf32>
    %82 = arith.addf %80, %81 : vector<1x32xf32>
    %83 = math.rsqrt %82 : vector<1x32xf32>
    %84 = vector.broadcast %83 : vector<1x32xf32> to vector<32x32xf32>
    %85 = arith.mulf %75, %84 : vector<32x32xf32>
    %86 = vector.extract_strided_slice %69 {offsets = [0, 0], sizes = [1, 32], strides = [1, 1]} : vector<2x32xf32> to vector<1x32xf32>
    %87 = vector.broadcast %86 : vector<1x32xf32> to vector<32x32xf32>
    %88 = arith.mulf %85, %87 : vector<32x32xf32>
    %89 = vector.extract_strided_slice %69 {offsets = [1, 0], sizes = [1, 32], strides = [1, 1]} : vector<2x32xf32> to vector<1x32xf32>
    %90 = vector.broadcast %89 : vector<1x32xf32> to vector<32x32xf32>
    %91 = arith.addf %88, %90 : vector<32x32xf32>
    %cst_41 = arith.constant 0.000000e+00 : f32
    %92 = vector.broadcast %cst_41 : f32 to vector<32x32xf32>
    %93 = arith.maximumf %91, %92 : vector<32x32xf32>
    %94 = arith.truncf %93 : vector<32x32xf32> to vector<32x32xbf16>
    %c0_42 = arith.constant 0 : index
    %c0_43 = arith.constant 0 : index
    %95 = vector.load %arg7[%c0_42, %c0_43] : memref<72x32xbf16, #tpu.memory_space<vmem>>, vector<72x32xbf16>
    %cst_44 = arith.constant dense<0.000000e+00> : vector<72x32xf32>
    %96 = tpu.matmul %95, %94, %cst_44 {dimension_numbers = #tpu.dot_dimension_numbers<[1], [0], [0], [1], [0, 0, 1, 1], [], []>} : vector<72x32xbf16>, vector<32x32xbf16>, vector<72x32xf32> -> vector<72x32xf32>
    %97 = arith.truncf %96 : vector<72x32xf32> to vector<72x32xbf16>
    %cst_45 = arith.constant 0.000000e+00 : f32
    %98 = vector.broadcast %cst_45 : f32 to vector<8x64xf32>
    %99 = vector.extract_strided_slice %97 {offsets = [0, 0], sizes = [8, 32], strides = [1, 1]} : vector<72x32xbf16> to vector<8x32xbf16>
    %c0_46 = arith.constant 0 : index
    %c0_47 = arith.constant 0 : index
    %100 = vector.load %arg8[%c0_46, %c0_47] : memref<288x64xbf16, #tpu.memory_space<vmem>>, vector<32x64xbf16>
    %cst_48 = arith.constant dense<0.000000e+00> : vector<8x64xf32>
    %101 = tpu.matmul %99, %100, %cst_48 {dimension_numbers = #tpu.dot_dimension_numbers<[1], [0], [0], [1], [0, 0, 1, 1], [], []>} : vector<8x32xbf16>, vector<32x64xbf16>, vector<8x64xf32> -> vector<8x64xf32>
    %102 = arith.addf %98, %101 : vector<8x64xf32>
    %103 = vector.extract_strided_slice %97 {offsets = [8, 0], sizes = [8, 32], strides = [1, 1]} : vector<72x32xbf16> to vector<8x32xbf16>
    %c32_49 = arith.constant 32 : index
    %c0_50 = arith.constant 0 : index
    %104 = vector.load %arg8[%c32_49, %c0_50] : memref<288x64xbf16, #tpu.memory_space<vmem>>, vector<32x64xbf16>
    %cst_51 = arith.constant dense<0.000000e+00> : vector<8x64xf32>
    %105 = tpu.matmul %103, %104, %cst_51 {dimension_numbers = #tpu.dot_dimension_numbers<[1], [0], [0], [1], [0, 0, 1, 1], [], []>} : vector<8x32xbf16>, vector<32x64xbf16>, vector<8x64xf32> -> vector<8x64xf32>
    %106 = arith.addf %102, %105 : vector<8x64xf32>
    %107 = vector.extract_strided_slice %97 {offsets = [16, 0], sizes = [8, 32], strides = [1, 1]} : vector<72x32xbf16> to vector<8x32xbf16>
    %c64_52 = arith.constant 64 : index
    %c0_53 = arith.constant 0 : index
    %108 = vector.load %arg8[%c64_52, %c0_53] : memref<288x64xbf16, #tpu.memory_space<vmem>>, vector<32x64xbf16>
    %cst_54 = arith.constant dense<0.000000e+00> : vector<8x64xf32>
    %109 = tpu.matmul %107, %108, %cst_54 {dimension_numbers = #tpu.dot_dimension_numbers<[1], [0], [0], [1], [0, 0, 1, 1], [], []>} : vector<8x32xbf16>, vector<32x64xbf16>, vector<8x64xf32> -> vector<8x64xf32>
    %110 = arith.addf %106, %109 : vector<8x64xf32>
    %111 = vector.extract_strided_slice %97 {offsets = [24, 0], sizes = [8, 32], strides = [1, 1]} : vector<72x32xbf16> to vector<8x32xbf16>
    %c96_55 = arith.constant 96 : index
    %c0_56 = arith.constant 0 : index
    %112 = vector.load %arg8[%c96_55, %c0_56] : memref<288x64xbf16, #tpu.memory_space<vmem>>, vector<32x64xbf16>
    %cst_57 = arith.constant dense<0.000000e+00> : vector<8x64xf32>
    %113 = tpu.matmul %111, %112, %cst_57 {dimension_numbers = #tpu.dot_dimension_numbers<[1], [0], [0], [1], [0, 0, 1, 1], [], []>} : vector<8x32xbf16>, vector<32x64xbf16>, vector<8x64xf32> -> vector<8x64xf32>
    %114 = arith.addf %110, %113 : vector<8x64xf32>
    %115 = vector.extract_strided_slice %97 {offsets = [32, 0], sizes = [8, 32], strides = [1, 1]} : vector<72x32xbf16> to vector<8x32xbf16>
    %c128_58 = arith.constant 128 : index
    %c0_59 = arith.constant 0 : index
    %116 = vector.load %arg8[%c128_58, %c0_59] : memref<288x64xbf16, #tpu.memory_space<vmem>>, vector<32x64xbf16>
    %cst_60 = arith.constant dense<0.000000e+00> : vector<8x64xf32>
    %117 = tpu.matmul %115, %116, %cst_60 {dimension_numbers = #tpu.dot_dimension_numbers<[1], [0], [0], [1], [0, 0, 1, 1], [], []>} : vector<8x32xbf16>, vector<32x64xbf16>, vector<8x64xf32> -> vector<8x64xf32>
    %118 = arith.addf %114, %117 : vector<8x64xf32>
    %119 = vector.extract_strided_slice %97 {offsets = [40, 0], sizes = [8, 32], strides = [1, 1]} : vector<72x32xbf16> to vector<8x32xbf16>
    %c160 = arith.constant 160 : index
    %c0_61 = arith.constant 0 : index
    %120 = vector.load %arg8[%c160, %c0_61] : memref<288x64xbf16, #tpu.memory_space<vmem>>, vector<32x64xbf16>
    %cst_62 = arith.constant dense<0.000000e+00> : vector<8x64xf32>
    %121 = tpu.matmul %119, %120, %cst_62 {dimension_numbers = #tpu.dot_dimension_numbers<[1], [0], [0], [1], [0, 0, 1, 1], [], []>} : vector<8x32xbf16>, vector<32x64xbf16>, vector<8x64xf32> -> vector<8x64xf32>
    %122 = arith.addf %118, %121 : vector<8x64xf32>
    %123 = vector.extract_strided_slice %97 {offsets = [48, 0], sizes = [8, 32], strides = [1, 1]} : vector<72x32xbf16> to vector<8x32xbf16>
    %c192 = arith.constant 192 : index
    %c0_63 = arith.constant 0 : index
    %124 = vector.load %arg8[%c192, %c0_63] : memref<288x64xbf16, #tpu.memory_space<vmem>>, vector<32x64xbf16>
    %cst_64 = arith.constant dense<0.000000e+00> : vector<8x64xf32>
    %125 = tpu.matmul %123, %124, %cst_64 {dimension_numbers = #tpu.dot_dimension_numbers<[1], [0], [0], [1], [0, 0, 1, 1], [], []>} : vector<8x32xbf16>, vector<32x64xbf16>, vector<8x64xf32> -> vector<8x64xf32>
    %126 = arith.addf %122, %125 : vector<8x64xf32>
    %127 = vector.extract_strided_slice %97 {offsets = [56, 0], sizes = [8, 32], strides = [1, 1]} : vector<72x32xbf16> to vector<8x32xbf16>
    %c224 = arith.constant 224 : index
    %c0_65 = arith.constant 0 : index
    %128 = vector.load %arg8[%c224, %c0_65] : memref<288x64xbf16, #tpu.memory_space<vmem>>, vector<32x64xbf16>
    %cst_66 = arith.constant dense<0.000000e+00> : vector<8x64xf32>
    %129 = tpu.matmul %127, %128, %cst_66 {dimension_numbers = #tpu.dot_dimension_numbers<[1], [0], [0], [1], [0, 0, 1, 1], [], []>} : vector<8x32xbf16>, vector<32x64xbf16>, vector<8x64xf32> -> vector<8x64xf32>
    %130 = arith.addf %126, %129 : vector<8x64xf32>
    %131 = vector.extract_strided_slice %97 {offsets = [64, 0], sizes = [8, 32], strides = [1, 1]} : vector<72x32xbf16> to vector<8x32xbf16>
    %c256 = arith.constant 256 : index
    %c0_67 = arith.constant 0 : index
    %132 = vector.load %arg8[%c256, %c0_67] : memref<288x64xbf16, #tpu.memory_space<vmem>>, vector<32x64xbf16>
    %cst_68 = arith.constant dense<0.000000e+00> : vector<8x64xf32>
    %133 = tpu.matmul %131, %132, %cst_68 {dimension_numbers = #tpu.dot_dimension_numbers<[1], [0], [0], [1], [0, 0, 1, 1], [], []>} : vector<8x32xbf16>, vector<32x64xbf16>, vector<8x64xf32> -> vector<8x64xf32>
    %134 = arith.addf %130, %133 : vector<8x64xf32>
    %c0_69 = arith.constant 0 : index
    %c0_70 = arith.constant 0 : index
    %135 = vector.load %arg9[%c0_69, %c0_70] : memref<2x64xf32, #tpu.memory_space<vmem>>, vector<2x64xf32>
    %cst_71 = arith.constant dense<0.000000e+00> : vector<64xf32>
    %136 = vector.multi_reduction <add>, %134, %cst_71 [0] : vector<8x64xf32> to vector<64xf32>
    %137 = vector.shape_cast %136 : vector<64xf32> to vector<1x64xf32>
    %cst_72 = arith.constant 8.000000e+00 : f32
    %138 = vector.broadcast %cst_72 : f32 to vector<1x64xf32>
    %139 = arith.divf %137, %138 : vector<1x64xf32>
    %140 = vector.broadcast %139 : vector<1x64xf32> to vector<8x64xf32>
    %141 = arith.subf %134, %140 : vector<8x64xf32>
    %142 = arith.mulf %141, %141 : vector<8x64xf32>
    %cst_73 = arith.constant dense<0.000000e+00> : vector<64xf32>
    %143 = vector.multi_reduction <add>, %142, %cst_73 [0] : vector<8x64xf32> to vector<64xf32>
    %144 = vector.shape_cast %143 : vector<64xf32> to vector<1x64xf32>
    %cst_74 = arith.constant 8.000000e+00 : f32
    %145 = vector.broadcast %cst_74 : f32 to vector<1x64xf32>
    %146 = arith.divf %144, %145 : vector<1x64xf32>
    %cst_75 = arith.constant 9.99999974E-6 : f32
    %147 = vector.broadcast %cst_75 : f32 to vector<1x64xf32>
    %148 = arith.addf %146, %147 : vector<1x64xf32>
    %149 = math.rsqrt %148 : vector<1x64xf32>
    %150 = vector.broadcast %149 : vector<1x64xf32> to vector<8x64xf32>
    %151 = arith.mulf %141, %150 : vector<8x64xf32>
    %152 = vector.extract_strided_slice %135 {offsets = [0, 0], sizes = [1, 64], strides = [1, 1]} : vector<2x64xf32> to vector<1x64xf32>
    %153 = vector.broadcast %152 : vector<1x64xf32> to vector<8x64xf32>
    %154 = arith.mulf %151, %153 : vector<8x64xf32>
    %155 = vector.extract_strided_slice %135 {offsets = [1, 0], sizes = [1, 64], strides = [1, 1]} : vector<2x64xf32> to vector<1x64xf32>
    %156 = vector.broadcast %155 : vector<1x64xf32> to vector<8x64xf32>
    %157 = arith.addf %154, %156 : vector<8x64xf32>
    %cst_76 = arith.constant 0.000000e+00 : f32
    %158 = vector.broadcast %cst_76 : f32 to vector<8x64xf32>
    %159 = arith.maximumf %157, %158 : vector<8x64xf32>
    %160 = arith.truncf %159 : vector<8x64xf32> to vector<8x64xbf16>
    %c0_77 = arith.constant 0 : index
    %c0_78 = arith.constant 0 : index
    %161 = vector.load %arg10[%c0_77, %c0_78] : memref<32x8xbf16, #tpu.memory_space<vmem>>, vector<32x8xbf16>
    %cst_79 = arith.constant dense<0.000000e+00> : vector<32x64xf32>
    %162 = tpu.matmul %161, %160, %cst_79 {dimension_numbers = #tpu.dot_dimension_numbers<[1], [0], [0], [1], [0, 0, 1, 1], [], []>} : vector<32x8xbf16>, vector<8x64xbf16>, vector<32x64xf32> -> vector<32x64xf32>
    %163 = arith.truncf %162 : vector<32x64xf32> to vector<32x64xbf16>
    %cst_80 = arith.constant 0.000000e+00 : f32
    %164 = vector.broadcast %cst_80 : f32 to vector<8x32xf32>
    %165 = vector.extract_strided_slice %163 {offsets = [0, 0], sizes = [8, 64], strides = [1, 1]} : vector<32x64xbf16> to vector<8x64xbf16>
    %c0_81 = arith.constant 0 : index
    %c0_82 = arith.constant 0 : index
    %166 = vector.load %arg11[%c0_81, %c0_82] : memref<256x32xbf16, #tpu.memory_space<vmem>>, vector<64x32xbf16>
    %cst_83 = arith.constant dense<0.000000e+00> : vector<8x32xf32>
    %167 = tpu.matmul %165, %166, %cst_83 {dimension_numbers = #tpu.dot_dimension_numbers<[1], [0], [0], [1], [0, 0, 1, 1], [], []>} : vector<8x64xbf16>, vector<64x32xbf16>, vector<8x32xf32> -> vector<8x32xf32>
    %168 = arith.addf %164, %167 : vector<8x32xf32>
    %169 = vector.extract_strided_slice %163 {offsets = [8, 0], sizes = [8, 64], strides = [1, 1]} : vector<32x64xbf16> to vector<8x64xbf16>
    %c64_84 = arith.constant 64 : index
    %c0_85 = arith.constant 0 : index
    %170 = vector.load %arg11[%c64_84, %c0_85] : memref<256x32xbf16, #tpu.memory_space<vmem>>, vector<64x32xbf16>
    %cst_86 = arith.constant dense<0.000000e+00> : vector<8x32xf32>
    %171 = tpu.matmul %169, %170, %cst_86 {dimension_numbers = #tpu.dot_dimension_numbers<[1], [0], [0], [1], [0, 0, 1, 1], [], []>} : vector<8x64xbf16>, vector<64x32xbf16>, vector<8x32xf32> -> vector<8x32xf32>
    %172 = arith.addf %168, %171 : vector<8x32xf32>
    %173 = vector.extract_strided_slice %163 {offsets = [16, 0], sizes = [8, 64], strides = [1, 1]} : vector<32x64xbf16> to vector<8x64xbf16>
    %c128_87 = arith.constant 128 : index
    %c0_88 = arith.constant 0 : index
    %174 = vector.load %arg11[%c128_87, %c0_88] : memref<256x32xbf16, #tpu.memory_space<vmem>>, vector<64x32xbf16>
    %cst_89 = arith.constant dense<0.000000e+00> : vector<8x32xf32>
    %175 = tpu.matmul %173, %174, %cst_89 {dimension_numbers = #tpu.dot_dimension_numbers<[1], [0], [0], [1], [0, 0, 1, 1], [], []>} : vector<8x64xbf16>, vector<64x32xbf16>, vector<8x32xf32> -> vector<8x32xf32>
    %176 = arith.addf %172, %175 : vector<8x32xf32>
    %177 = vector.extract_strided_slice %163 {offsets = [24, 0], sizes = [8, 64], strides = [1, 1]} : vector<32x64xbf16> to vector<8x64xbf16>
    %c192_90 = arith.constant 192 : index
    %c0_91 = arith.constant 0 : index
    %178 = vector.load %arg11[%c192_90, %c0_91] : memref<256x32xbf16, #tpu.memory_space<vmem>>, vector<64x32xbf16>
    %cst_92 = arith.constant dense<0.000000e+00> : vector<8x32xf32>
    %179 = tpu.matmul %177, %178, %cst_92 {dimension_numbers = #tpu.dot_dimension_numbers<[1], [0], [0], [1], [0, 0, 1, 1], [], []>} : vector<8x64xbf16>, vector<64x32xbf16>, vector<8x32xf32> -> vector<8x32xf32>
    %180 = arith.addf %176, %179 : vector<8x32xf32>
    %c0_93 = arith.constant 0 : index
    %c0_94 = arith.constant 0 : index
    %181 = vector.load %arg12[%c0_93, %c0_94] : memref<1x32xf32, #tpu.memory_space<vmem>>, vector<1x32xf32>
    %182 = vector.broadcast %181 : vector<1x32xf32> to vector<8x32xf32>
    %183 = arith.addf %180, %182 : vector<8x32xf32>
    %c0_95 = arith.constant 0 : index
    %c0_96 = arith.constant 0 : index
    %184 = vector.load %arg13[%c0_95, %c0_96] : memref<8x32xf32, #tpu.memory_space<vmem>>, vector<8x32xf32>
    tpu.vector_store %arg13[%c0_95, %c0_96], %183 {strides = array<i32>} : memref<8x32xf32, #tpu.memory_space<vmem>>, vector<8x32xf32>,
    return
  }
  func.func @transform_0(%arg0: i32) -> (i32, i32) {
    %c0_i32 = arith.constant 0 : i32
    %c0_i32_0 = arith.constant 0 : i32
    %c0_i32_1 = arith.constant 0 : i32
    return %c0_i32, %c0_i32_0 : i32, i32
  }
  func.func @transform_1(%arg0: i32) -> (i32, i32) {
    %c0_i32 = arith.constant 0 : i32
    %c0_i32_0 = arith.constant 0 : i32
    %c0_i32_1 = arith.constant 0 : i32
    return %c0_i32, %c0_i32_0 : i32, i32
  }
  func.func @transform_2(%arg0: i32) -> (i32, i32) {
    %c0_i32 = arith.constant 0 : i32
    %c0_i32_0 = arith.constant 0 : i32
    %c0_i32_1 = arith.constant 0 : i32
    return %c0_i32, %c0_i32_0 : i32, i32
  }
  func.func @transform_3(%arg0: i32) -> (i32, i32) {
    %c0_i32 = arith.constant 0 : i32
    %c0_i32_0 = arith.constant 0 : i32
    %c0_i32_1 = arith.constant 0 : i32
    return %c0_i32, %c0_i32_0 : i32, i32
  }
  func.func @transform_4(%arg0: i32) -> (i32, i32) {
    %c0_i32 = arith.constant 0 : i32
    %c0_i32_0 = arith.constant 0 : i32
    %c0_i32_1 = arith.constant 0 : i32
    return %c0_i32, %c0_i32_0 : i32, i32
  }
  func.func @transform_5(%arg0: i32) -> (i32, i32) {
    %c0_i32 = arith.constant 0 : i32
    %c0_i32_0 = arith.constant 0 : i32
    %c0_i32_1 = arith.constant 0 : i32
    return %c0_i32, %c0_i32_0 : i32, i32
  }
  func.func @transform_6(%arg0: i32) -> (i32, i32) {
    %c0_i32 = arith.constant 0 : i32
    %c0_i32_0 = arith.constant 0 : i32
    %c0_i32_1 = arith.constant 0 : i32
    return %c0_i32, %c0_i32_0 : i32, i32
  }
  func.func @transform_7(%arg0: i32) -> (i32, i32) {
    %c0_i32 = arith.constant 0 : i32
    %c0_i32_0 = arith.constant 0 : i32
    %c0_i32_1 = arith.constant 0 : i32
    return %c0_i32, %c0_i32_0 : i32, i32
  }
  func.func @transform_8(%arg0: i32) -> (i32, i32) {
    %c0_i32 = arith.constant 0 : i32
    %c0_i32_0 = arith.constant 0 : i32
    %c0_i32_1 = arith.constant 0 : i32
    return %c0_i32, %c0_i32_0 : i32, i32
  }
  func.func @transform_9(%arg0: i32) -> (i32, i32) {
    %c0_i32 = arith.constant 0 : i32
    %c0_i32_0 = arith.constant 0 : i32
    %c0_i32_1 = arith.constant 0 : i32
    return %c0_i32, %c0_i32_0 : i32, i32
  }
  func.func @transform_10(%arg0: i32) -> (i32, i32) {
    %c0_i32 = arith.constant 0 : i32
    %c0_i32_0 = arith.constant 0 : i32
    %c0_i32_1 = arith.constant 0 : i32
    return %c0_i32, %c0_i32_0 : i32, i32
  }
  func.func @transform_11(%arg0: i32) -> (i32, i32) {
    %c0_i32 = arith.constant 0 : i32
    %c0_i32_0 = arith.constant 0 : i32
    %c0_i32_1 = arith.constant 0 : i32
    return %c0_i32, %c0_i32_0 : i32, i32
  }
  func.func @transform_12(%arg0: i32) -> (i32, i32) {
    %c0_i32 = arith.constant 0 : i32
    %c0_i32_0 = arith.constant 0 : i32
    %c0_i32_1 = arith.constant 0 : i32
    return %c0_i32, %c0_i32_0 : i32, i32
  }
}

</mosaic_0001>

<bundles_post_ra>
// kernel: encoder_forward.1
= control target key start
LH: loop header
LB: loop body
LE: loop exit
PB: predicated region body
PF: predicated region fallthrough
CT: control target
= control target key end

     0   :  { %vm114_vm0 = vcmask 261120   ;;  %vm189_vm1 = vcmask 130048   ;;  %v2295_v42 = vmov 128.0   ;;  %vm1544_vm10 = vcmask 523264   ;;  %s2871_s1 = inlined_call_operand.vmem [shape: bf16[32,16], index: 1, kind: input, shape index: {}]   ;;  %s2872_s0 = inlined_call_operand.vmem [shape: bf16[128,32], index: 0, kind: input, shape index: {}]   ;;  %s2873_s2 = inlined_call_operand.vmem [shape: f32[2,16], index: 2, kind: input, shape index: {}]   ;;  %s2874_s3 = inlined_call_operand.vmem [shape: bf16[288,128], index: 3, kind: input, shape index: {}]   ;;  %s2875_s4 = inlined_call_operand.vmem [shape: bf16[144,32], index: 4, kind: input, shape index: {}]   ;;  %s2876_s5 = inlined_call_operand.vmem [shape: f32[2,32], index: 5, kind: input, shape index: {}]   ;;  %s2877_s6 = inlined_call_operand.vmem [shape: bf16[72,32], index: 6, kind: input, shape index: {}]   ;;  %s2878_s7 = inlined_call_operand.vmem [shape: bf16[288,64], index: 7, kind: input, shape index: {}]   ;;  %s2879_s8 = inlined_call_operand.vmem [shape: f32[2,64], index: 8, kind: input, shape index: {}]   ;;  %s2880_s10 = inlined_call_operand.vmem [shape: bf16[256,32], index: 10, kind: input, shape index: {}]   ;;  %s2881_s9 = inlined_call_operand.vmem [shape: bf16[32,8], index: 9, kind: input, shape index: {}]   ;;  %s2882_s11 = inlined_call_operand.vmem [shape: f32[1,32], index: 11, kind: input, shape index: {}]   ;;  %s2883_s12 = inlined_call_operand.vmem [shape: f32[8,32], index: 12, kind: output, shape index: {}]  }
   0x1   :  { %v2203_v0 = vld [vmem:[%s2871_s1 + $0x8] sm:$0xff]  ;;  %v2202_v1 = vld [vmem:[%s2871_s1] sm:$0xff]  ;;  %v2196_v4 = vld [vmem:[%s2872_s0 + $0x10] sm:$0xff]  ;;  %2283 = vrcp.f32 %v2295_v42  ;;  %vm1609_vm15 = vcmask 1043456  }
   0x2   :  { %145 = vmatpush.bf16.msra.mxu0 %v2203_v0  ;;  %v2194_v2 = vld [vmem:[%s2872_s0] sm:$0xff]  ;;  %v2195_v3 = vld [vmem:[%s2872_s0 + $0x8] sm:$0xff]  ;;  %v2197_v5 = vld [vmem:[%s2872_s0 + $0x18] sm:$0xff] }
   0x3   :  { %v2198_v6 = vld [vmem:[%s2872_s0 + $0x20] sm:$0xff]  ;;  %v2199_v7 = vld [vmem:[%s2872_s0 + $0x28] sm:$0xff]  ;;  %v2200_v8 = vld [vmem:[%s2872_s0 + $0x30] sm:$0xff] }
   0x4   :  { %v2201_v9 = vld [vmem:[%s2872_s0 + $0x38] sm:$0xff] }
   0x6   :  { %146 = vmatpush.bf16.msra.mxu0 %v2202_v1 }
   0x7   :  { %v2284_v49 = vpop.eup %2283 }
   0x8   :  { %v228_v54 = vmul.f32 128.0, %v2284_v49  ;;  %vm232_vm2 = vweird.f32 %v2284_v49 }
   0x9   :  { %1880 = vmatmul.msk.bf16.vlgmr.msra.gmra.mxu0 %vm114_vm0, %v2194_v2 }
   0xa   :  { %v229_v59 = vsub.f32 1.0, %v228_v54 }
   0xc   :  { %v230_v62 = vmul.f32 %v2284_v49, %v229_v59 }
   0xe   :  { %v231_v1 = vadd.f32 %v2284_v49, %v230_v62 }
  0x19   :  { %1881 = vmatmul.msk.bf16.gmra.mxu0 %vm114_vm0, %v2195_v3 }
  0x29   :  { %1882 = vmatmul.msk.bf16.gmra.mxu0 %vm114_vm0, %v2196_v4  ;;  %v2465_v4 = vsel %vm232_vm2, %v2284_v49, %v231_v1 }
  0x39   :  { %1883 = vmatmul.msk.bf16.gmra.mxu0 %vm114_vm0, %v2197_v5 }
  0x49   :  { %1884 = vmatmul.msk.bf16.gmra.mxu0 %vm114_vm0, %v2198_v6 }
  0x59   :  { %1885 = vmatmul.msk.bf16.gmra.mxu0 %vm114_vm0, %v2199_v7 }
  0x69   :  { %1886 = vmatmul.msk.bf16.gmra.mxu0 %vm114_vm0, %v2200_v8 }
  0x79   :  { %1887 = vmatmul.msk.bf16.gmra.mxu0 %vm114_vm0, %v2201_v9 }
  0x86   :  { %v2401_v10 = vpop.f32.mrf.mxu0 }
  0x87   :  { %v190_v23 = vsel %vm189_vm1, %v2401_v10, 0.0 }
  0x8e   :  { %v2403_v11 = vpop.f32.mrf.mxu0 }
  0x8f   :  { %v191_v22 = vsel %vm189_vm1, %v2403_v11, 0.0 }
  0x90   :  { %v192_v25 = vadd.f32 %v191_v22, %v190_v23 }
  0x96   :  { %v2405_v12 = vpop.f32.mrf.mxu0 }
  0x97   :  { %v193_v24 = vsel %vm189_vm1, %v2405_v12, 0.0 }
  0x98   :  { %v194_v27 = vadd.f32 %v193_v24, %v192_v25 }
  0x9e   :  { %v2407_v13 = vpop.f32.mrf.mxu0 }
  0x9f   :  { %v195_v26 = vsel %vm189_vm1, %v2407_v13, 0.0 }
  0xa0   :  { %v196_v30 = vadd.f32 %v195_v26, %v194_v27 }
  0xa6   :  { %v2409_v14 = vpop.f32.mrf.mxu0 }
  0xa7   :  { %v197_v29 = vsel %vm189_vm1, %v2409_v14, 0.0 }
  0xa8   :  { %v198_v32 = vadd.f32 %v197_v29, %v196_v30 }
  0xae   :  { %v2411_v15 = vpop.f32.mrf.mxu0 }
  0xaf   :  { %v199_v31 = vsel %vm189_vm1, %v2411_v15, 0.0 }
  0xb0   :  { %v200_v34 = vadd.f32 %v199_v31, %v198_v32 }
  0xb6   :  { %v2413_v16 = vpop.f32.mrf.mxu0 }
  0xb7   :  { %v201_v33 = vsel %vm189_vm1, %v2413_v16, 0.0 }
  0xb8   :  { %v202_v36 = vadd.f32 %v201_v33, %v200_v34 }
  0xbe   :  { %v2415_v17 = vpop.f32.mrf.mxu0 }
  0xbf   :  { %v203_v35 = vsel %vm189_vm1, %v2415_v17, 0.0 }
  0xc0   :  { %v204_v39 = vadd.f32 %v203_v35, %v202_v36 }
  0xc6   :  { %v2417_v18 = vpop.f32.mrf.mxu0 }
  0xc7   :  { %v205_v38 = vsel %vm189_vm1, %v2417_v18, 0.0 }
  0xc8   :  { %v206_v41 = vadd.f32 %v205_v38, %v204_v39 }
  0xce   :  { %v2419_v19 = vpop.f32.mrf.mxu0 }
  0xcf   :  { %v207_v40 = vsel %vm189_vm1, %v2419_v19, 0.0 }
  0xd0   :  { %v208_v44 = vadd.f32 %v207_v40, %v206_v41 }
  0xd6   :  { %v2421_v20 = vpop.f32.mrf.mxu0 }
  0xd7   :  { %v209_v43 = vsel %vm189_vm1, %v2421_v20, 0.0 }
  0xd8   :  { %v210_v46 = vadd.f32 %v209_v43, %v208_v44 }
  0xde   :  { %v2423_v21 = vpop.f32.mrf.mxu0 }
  0xdf   :  { %v211_v45 = vsel %vm189_vm1, %v2423_v21, 0.0 }
  0xe0   :  { %v212_v50 = vadd.f32 %v211_v45, %v210_v46 }
  0xe6   :  { %v2433_v28 = vpop.f32.mrf.mxu0 }
  0xe7   :  { %v213_v48 = vsel %vm189_vm1, %v2433_v28, 0.0 }
  0xe8   :  { %v214_v52 = vadd.f32 %v213_v48, %v212_v50 }
  0xee   :  { %v2443_v37 = vpop.f32.mrf.mxu0 }
  0xef   :  { %v215_v51 = vsel %vm189_vm1, %v2443_v37, 0.0 }
  0xf0   :  { %v216_v55 = vadd.f32 %v215_v51, %v214_v52 }
  0xf6   :  { %v2453_v47 = vpop.f32.mrf.mxu0 }
  0xf7   :  { %v217_v53 = vsel %vm189_vm1, %v2453_v47, 0.0 }
  0xf8   :  { %v218_v56 = vadd.f32 %v217_v53, %v216_v55 }
  0xfe   :  { %v2461_v57 = vpop.f32.mrf.mxu0 }
  0xff   :  { %v219_v58 = vsel %vm189_vm1, %v2461_v57, 0.0 }
 0x100   :  { %v220_v60 = vadd.f32 %v219_v58, %v218_v56 }
 0x102   :  { %v221_v61 = vrot.slane %v220_v60, 4 }
 0x104   :  { %v222_v63 = vadd.f32 %v221_v61, %v220_v60 }
 0x106   :  { %v223_v0 = vrot.slane %v222_v63, 2 }
 0x108   :  { %v224_v2 = vadd.f32 %v223_v0, %v222_v63 }
 0x10a   :  { %v225_v3 = vrot.slane %v224_v2, 1 }
 0x10c   :  { %v226_v5 = vadd.f32 %v225_v3, %v224_v2 }
 0x10e   :  { %v234_v6 = vmul.f32 %v2465_v4, %v226_v5 }
 0x110   :  { %v2469_v7 = vsub.f32 %v2401_v10, %v234_v6  ;;  %v2472_v8 = vsub.f32 %v2403_v11, %v234_v6  ;;  %v2475_v9 = vsub.f32 %v2405_v12, %v234_v6  ;;  %v2478_v22 = vsub.f32 %v2407_v13, %v234_v6 }
 0x111   :  { %v2485_v25 = vsub.f32 %v2409_v14, %v234_v6  ;;  %v2490_v11 = vsub.f32 %v2411_v15, %v234_v6  ;;  %v2497_v29 = vsub.f32 %v2413_v16, %v234_v6  ;;  %v2503_v15 = vsub.f32 %v2415_v17, %v234_v6 }
 0x112   :  { %v251_v23 = vmul.f32 %v2469_v7, %v2469_v7  ;;  %v252_v24 = vmul.f32 %v2472_v8, %v2472_v8  ;;  %v253_v10 = vmul.f32 %v2475_v9, %v2475_v9  ;;  %v254_v12 = vmul.f32 %v2478_v22, %v2478_v22 }
 0x113   :  { %v255_v14 = vmul.f32 %v2485_v25, %v2485_v25  ;;  %v256_v32 = vmul.f32 %v2490_v11, %v2490_v11  ;;  %v2509_v35 = vsub.f32 %v2417_v18, %v234_v6  ;;  %v257_v16 = vmul.f32 %v2497_v29, %v2497_v29 }
 0x114   :  { %v267_v13 = vsel %vm189_vm1, %v251_v23, 0.0  ;;  %v268_v26 = vsel %vm189_vm1, %v252_v24, 0.0  ;;  %v270_v30 = vsel %vm189_vm1, %v253_v10, 0.0  ;;  %v272_v33 = vsel %vm189_vm1, %v254_v12, 0.0 }
 0x115   :  { %v269_v27 = vadd.f32 %v268_v26, %v267_v13  ;;  %v274_v36 = vsel %vm189_vm1, %v255_v14, 0.0  ;;  %v2515_v39 = vsub.f32 %v2419_v19, %v234_v6  ;;  %v258_v17 = vmul.f32 %v2503_v15, %v2503_v15 }
 0x116   :  { %v276_v40 = vsel %vm189_vm1, %v256_v32, 0.0  ;;  %v245_v42 = vsub.f32 %v2421_v20, %v234_v6  ;;  %v259_v18 = vmul.f32 %v2509_v35, %v2509_v35  ;;  %v278_v43 = vsel %vm189_vm1, %v257_v16, 0.0 }
 0x117   :  { %v271_v31 = vadd.f32 %v270_v30, %v269_v27  ;;  %v246_v45 = vsub.f32 %v2423_v21, %v234_v6  ;;  %v260_v19 = vmul.f32 %v2515_v39, %v2515_v39  ;;  %v280_v46 = vsel %vm189_vm1, %v258_v17, 0.0 }
 0x118   :  { %v247_v49 = vsub.f32 %v2433_v28, %v234_v6  ;;  %v261_v50 = vmul.f32 %v245_v42, %v245_v42  ;;  %v282_v51 = vsel %vm189_vm1, %v259_v18, 0.0  ;;  %v248_v52 = vsub.f32 %v2443_v37, %v234_v6 }
 0x119   :  { %v273_v34 = vadd.f32 %v272_v33, %v271_v31  ;;  %v262_v53 = vmul.f32 %v246_v45, %v246_v45  ;;  %v284_v54 = vsel %vm189_vm1, %v260_v19, 0.0  ;;  %v249_v21 = vsub.f32 %v2453_v47, %v234_v6 }
 0x11a   :  { %v263_v56 = vmul.f32 %v247_v49, %v247_v49  ;;  %v286_v58 = vsel %vm189_vm1, %v261_v50, 0.0  ;;  %v250_v60 = vsub.f32 %v2461_v57, %v234_v6  ;;  %v264_v61 = vmul.f32 %v248_v52, %v248_v52 }
 0x11b   :  { %v275_v38 = vadd.f32 %v274_v36, %v273_v34  ;;  %v288_v28 = vsel %vm189_vm1, %v262_v53, 0.0  ;;  %v265_v63 = vmul.f32 %v249_v21, %v249_v21  ;;  %v188_v34 = vld [vmem:[%s2873_s2] sm:$0x3] }
 0x11c   :  { %v290_v0 = vsel %vm189_vm1, %v263_v56, 0.0  ;;  %v266_v1 = vmul.f32 %v250_v60, %v250_v60  ;;  %v292_v2 = vsel %vm189_vm1, %v264_v61, 0.0 }
 0x11d   :  { %v277_v41 = vadd.f32 %v276_v40, %v275_v38  ;;  %v294_v47 = vsel %vm189_vm1, %v265_v63, 0.0  ;;  %v2544_v38 = vperm.slane %v188_v34, 0  ;;  %v2546_v40 = vperm.slane %v188_v34, 1 }
 0x11e   :  { %v296_v23 = vsel %vm189_vm1, %v266_v1, 0.0 }
 0x11f   :  { %v279_v44 = vadd.f32 %v278_v43, %v277_v41 }
 0x121   :  { %v281_v48 = vadd.f32 %v280_v46, %v279_v44 }
 0x123   :  { %v283_v20 = vadd.f32 %v282_v51, %v281_v48 }
 0x125   :  { %v285_v55 = vadd.f32 %v284_v54, %v283_v20 }
 0x127   :  { %v287_v59 = vadd.f32 %v286_v58, %v285_v55 }
 0x129   :  { %v289_v62 = vadd.f32 %v288_v28, %v287_v59 }
 0x12b   :  { %v291_v37 = vadd.f32 %v290_v0, %v289_v62 }
 0x12d   :  { %v293_v3 = vadd.f32 %v292_v2, %v291_v37 }
 0x12f   :  { %v295_v5 = vadd.f32 %v294_v47, %v293_v3 }
 0x131   :  { %v297_v24 = vadd.f32 %v296_v23, %v295_v5 }
 0x133   :  { %v298_v10 = vrot.slane %v297_v24, 4 }
 0x135   :  { %v299_v57 = vadd.f32 %v298_v10, %v297_v24 }
 0x137   :  { %v300_v6 = vrot.slane %v299_v57, 2 }
 0x139   :  { %v301_v12 = vadd.f32 %v300_v6, %v299_v57 }
 0x13b   :  { %v302_v13 = vrot.slane %v301_v12, 1 }
 0x13d   :  { %v303_v26 = vadd.f32 %v302_v13, %v301_v12 }
 0x13f   :  { %v304_v27 = vmul.f32 %v303_v26, %v2465_v4 }
 0x141   :  { %v305_v14 = vadd.f32 1e-05, %v304_v27 }
 0x143   :  { %2285 = vrsqrt.f32 %v305_v14  ;;  %vm312_vm4 = vweird.f32 %v305_v14 }
 0x149   :  { %v2286_v30 = vpop.eup %2285 }
 0x14a   :  { %v307_v31 = vmul.f32 %v2286_v30, %v305_v14  ;;  %vm313_vm3 = vweird.f32 %v2286_v30 }
 0x14b   :  { %vm314_vm5 = vmor %vm312_vm4, %vm313_vm3 }
 0x14c   :  { %v308_v32 = vmul.f32 %v2286_v30, %v307_v31 }
 0x14e   :  { %v309_v33 = vmul.f32 0.5, %v308_v32 }
 0x150   :  { %v310_v16 = vsub.f32 1.5, %v309_v33 }
 0x152   :  { %v311_v36 = vmul.f32 %v2286_v30, %v310_v16 }
 0x154   :  { %v315_v17 = vsel %vm314_vm5, %v2286_v30, %v311_v36 }
 0x155   :  { %v331_v4 = vmul.f32 %v315_v17, %v250_v60  ;;  %v330_v41 = vmul.f32 %v315_v17, %v249_v21  ;;  %v328_v18 = vmul.f32 %v315_v17, %v247_v49  ;;  %v329_v43 = vmul.f32 %v315_v17, %v248_v52 }
 0x156   :  { %v326_v44 = vmul.f32 %v315_v17, %v245_v42  ;;  %v327_v19 = vmul.f32 %v315_v17, %v246_v45  ;;  %v324_v46 = vmul.f32 %v315_v17, %v2509_v35  ;;  %v325_v48 = vmul.f32 %v315_v17, %v2515_v39 }
 0x157   :  { %v348_v50 = vmul.f32 %v2544_v38, %v331_v4  ;;  %v347_v51 = vmul.f32 %v2544_v38, %v330_v41  ;;  %v345_v20 = vmul.f32 %v2544_v38, %v328_v18  ;;  %v346_v53 = vmul.f32 %v2544_v38, %v329_v43 }
 0x158   :  { %v343_v54 = vmul.f32 %v2544_v38, %v326_v44  ;;  %v344_v55 = vmul.f32 %v2544_v38, %v327_v19  ;;  %v341_v49 = vmul.f32 %v2544_v38, %v324_v46  ;;  %v342_v42 = vmul.f32 %v2544_v38, %v325_v48 }
 0x159   :  { %v364_v35 = vadd.f32 %v2546_v40, %v347_v51  ;;  %v365_v39 = vadd.f32 %v2546_v40, %v348_v50  ;;  %v362_v45 = vadd.f32 %v2546_v40, %v345_v20  ;;  %v363_v52 = vadd.f32 %v2546_v40, %v346_v53  ;;  %v2204_v51 = vld [vmem:[%s2874_s3] sm:$0xff]  ;;  %v2206_v20 = vld [vmem:[%s2874_s3 + $0x10] sm:$0xff]  ;;  %v2207_v53 = vld [vmem:[%s2874_s3 + $0x18] sm:$0xff] }
 0x15a   :  { %v360_v21 = vadd.f32 %v2546_v40, %v343_v54  ;;  %v361_v56 = vadd.f32 %v2546_v40, %v344_v55  ;;  %v358_v58 = vadd.f32 %v2546_v40, %v341_v49  ;;  %v359_v59 = vadd.f32 %v2546_v40, %v342_v42  ;;  %v2208_v54 = vld [vmem:[%s2874_s3 + $0x20] sm:$0xff]  ;;  %v2209_v55 = vld [vmem:[%s2874_s3 + $0x28] sm:$0xff]  ;;  %v2210_v49 = vld [vmem:[%s2874_s3 + $0x30] sm:$0xff] }
 0x15b   :  { %v380_v60 = vmax.f32 %v364_v35, 0.0  ;;  %v381_v61 = vmax.f32 %v365_v39, 0.0  ;;  %v378_v28 = vmax.f32 %v362_v45, 0.0  ;;  %v379_v2 = vmax.f32 %v363_v52, 0.0  ;;  %v2211_v42 = vld [vmem:[%s2874_s3 + $0x38] sm:$0xff]  ;;  %v2212_v35 = vld [vmem:[%s2874_s3 + $0x40] sm:$0xff] }
 0x15c   :  { %v376_v62 = vmax.f32 %v360_v21, 0.0  ;;  %v377_v63 = vmax.f32 %v361_v56, 0.0  ;;  %v374_v0 = vmax.f32 %v358_v58, 0.0  ;;  %v375_v37 = vmax.f32 %v359_v59, 0.0  ;;  %v2223_v39 = vld [vmem:[%s2875_s4 + $0x8] sm:$0xff]  ;;  %v2222_v45 = vld [vmem:[%s2875_s4] sm:$0xff] }
 0x15d   :  { %v389_v1 = vpack.c.bf16 %v381_v61, %v380_v60  ;;  %v322_v3 = vmul.f32 %v315_v17, %v2497_v29  ;;  %v323_v47 = vmul.f32 %v315_v17, %v2503_v15  ;;  %v320_v24 = vmul.f32 %v315_v17, %v2485_v25  ;;  %v2213_v52 = vld [vmem:[%s2874_s3 + $0x48] sm:$0xff]  ;;  %702 = vmatpush.bf16.msra.mxu2 %v2223_v39  ;;  %v2214_v21 = vld [vmem:[%s2874_s3 + $0x50] sm:$0xff] }
 0x15e   :  { %v387_v5 = vpack.c.bf16 %v377_v63, %v376_v62  ;;  %v386_v23 = vpack.c.bf16 %v375_v37, %v374_v0  ;;  %v388_v10 = vpack.c.bf16 %v379_v2, %v378_v28  ;;  %v321_v12 = vmul.f32 %v315_v17, %v2490_v11  ;;  %743 = vmatpush.bf16.msra.mxu3 %v2222_v45 }
 0x15f   :  { %534 = vmatpush.bf16.msrb.mxu0 %v389_v1  ;;  %2271 = vmatpush.bf16.msra.mxu1 %v389_v1  ;;  %v339_v57 = vmul.f32 %v2544_v38, %v322_v3  ;;  %v340_v6 = vmul.f32 %v2544_v38, %v323_v47  ;;  %v337_v13 = vmul.f32 %v2544_v38, %v320_v24 }
 0x160   :  { %v318_v29 = vmul.f32 %v315_v17, %v2475_v9  ;;  %v338_v27 = vmul.f32 %v2544_v38, %v321_v12  ;;  %v319_v25 = vmul.f32 %v315_v17, %v2478_v22  ;;  %v316_v30 = vmul.f32 %v315_v17, %v2469_v7 }
 0x161   :  { %v356_v15 = vadd.f32 %v2546_v40, %v339_v57  ;;  %v357_v26 = vadd.f32 %v2546_v40, %v340_v6  ;;  %v354_v14 = vadd.f32 %v2546_v40, %v337_v13  ;;  %v317_v31 = vmul.f32 %v315_v17, %v2472_v8 }
 0x162   :  { %v335_v11 = vmul.f32 %v2544_v38, %v318_v29  ;;  %v355_v33 = vadd.f32 %v2546_v40, %v338_v27  ;;  %v336_v34 = vmul.f32 %v2544_v38, %v319_v25  ;;  %v333_v16 = vmul.f32 %v2544_v38, %v316_v30 }
 0x163   :  { %535 = vmatpush.bf16.msrb.mxu0 %v388_v10  ;;  %2272 = vmatpush.bf16.msra.mxu1 %v388_v10  ;;  %v372_v32 = vmax.f32 %v356_v15, 0.0  ;;  %v373_v9 = vmax.f32 %v357_v26, 0.0  ;;  %v334_v36 = vmul.f32 %v2544_v38, %v317_v31  ;;  %v370_v41 = vmax.f32 %v354_v14, 0.0  ;;  %v2216_v31 = vld [vmem:[%s2874_s3 + $0x60] sm:$0xff] }
 0x164   :  { %v352_v22 = vadd.f32 %v2546_v40, %v335_v11  ;;  %v371_v18 = vmax.f32 %v355_v33, 0.0  ;;  %v353_v7 = vadd.f32 %v2546_v40, %v336_v34  ;;  %v350_v8 = vadd.f32 %v2546_v40, %v333_v16 }
 0x165   :  { %v385_v4 = vpack.c.bf16 %v373_v9, %v372_v32  ;;  %v351_v19 = vadd.f32 %v2546_v40, %v334_v36  ;;  %v2205_v40 = vld [vmem:[%s2874_s3 + $0x8] sm:$0xff] }
 0x166   :  { %v384_v17 = vpack.c.bf16 %v371_v18, %v370_v41  ;;  %v368_v43 = vmax.f32 %v352_v22, 0.0  ;;  %v369_v44 = vmax.f32 %v353_v7, 0.0  ;;  %v366_v48 = vmax.f32 %v350_v8, 0.0  ;;  %v2217_v41 = vld [vmem:[%s2874_s3 + $0x68] sm:$0xff] }
 0x167   :  { %536 = vmatpush.bf16.msrb.mxu0 %v387_v5  ;;  %2273 = vmatpush.bf16.msra.mxu1 %v387_v5  ;;  %v367_v50 = vmax.f32 %v351_v19, 0.0  ;;  %v2224_v5 = vld [vmem:[%s2875_s4 + $0x10] sm:$0xff] }
 0x168   :  { %v383_v46 = vpack.c.bf16 %v369_v44, %v368_v43  ;;  %786 = vmatpush.bf16.msrb.mxu2 %v2224_v5 }
 0x169   :  { %v382_v38 = vpack.c.bf16 %v367_v50, %v366_v48 }
 0x16b   :  { %537 = vmatpush.bf16.msrb.mxu0 %v386_v23  ;;  %2274 = vmatpush.bf16.msra.mxu1 %v386_v23  ;;  %v2215_v23 = vld [vmem:[%s2874_s3 + $0x58] sm:$0xff] }
 0x16f   :  { %538 = vmatpush.bf16.msrb.mxu0 %v385_v4  ;;  %2275 = vmatpush.bf16.msra.mxu1 %v385_v4  ;;  %v2225_v4 = vld [vmem:[%s2875_s4 + $0x18] sm:$0xff] }
 0x170   :  { %833 = vmatpush.bf16.msrb.mxu3 %v2225_v4 }
 0x173   :  { %539 = vmatpush.bf16.msrb.mxu0 %v384_v17  ;;  %2276 = vmatpush.bf16.msra.mxu1 %v384_v17 }
 0x177   :  { %540 = vmatpush.bf16.msrb.mxu0 %v383_v46  ;;  %2277 = vmatpush.bf16.msra.mxu1 %v383_v46  ;;  %v2218_v46 = vld [vmem:[%s2874_s3 + $0x70] sm:$0xff] }
 0x17b   :  { %541 = vmatpush.bf16.msrb.mxu0 %v382_v38  ;;  %2278 = vmatpush.bf16.msra.mxu1 %v382_v38 }
 0x17e   :  { %542 = vmatmul.bf16.vlgmr.msrb.gmra.mxu0 %v2204_v51  ;;  %552 = vmatmul.bf16.vlgmr.msra.gmra.mxu1 %v2206_v20 }
 0x18e   :  { %547 = vmatmul.bf16.gmra.mxu0 %v2205_v40  ;;  %557 = vmatmul.bf16.gmra.mxu1 %v2207_v53 }
 0x19e   :  { %562 = vmatmul.bf16.gmra.mxu1 %v2208_v54  ;;  %v2226_v54 = vld [vmem:[%s2875_s4 + $0x20] sm:$0xff] }
 0x1ae   :  { %567 = vmatmul.bf16.gmra.mxu1 %v2209_v55  ;;  %v2219_v55 = vld [vmem:[%s2874_s3 + $0x78] sm:$0xff] }
 0x1be   :  { %572 = vmatmul.bf16.gmra.mxu1 %v2210_v49 }
 0x1ce   :  { %577 = vmatmul.bf16.gmra.mxu1 %v2211_v42 }
 0x1de   :  { %582 = vmatmul.bf16.gmra.mxu1 %v2212_v35 }
 0x1ee   :  { %587 = vmatmul.bf16.gmra.mxu1 %v2213_v52 }
 0x1fb   :  { %v543_v56 = vpop.f32.mrf.mxu0  ;;  %v553_v58 = vpop.f32.mrf.mxu1 }
 0x1fc   :  { %v633_v59 = vpack.c.bf16 %v543_v56, %v543_v56  ;;  %v637_v60 = vpack.c.bf16 %v553_v58, %v553_v58  ;;  %v2220_v56 = vld [vmem:[%s2874_s3 + $0x80] sm:$0xff] }
 0x1fe   :  { %592 = vmatmul.bf16.gmra.mxu1 %v2214_v21  ;;  %v718_v62 = vunpack.c.l.b16 %v633_v59  ;;  %v677_v37 = vunpack.c.l.b16 %v637_v60 }
 0x203   :  { %v545_v61 = vpop.f32.mrf.mxu0  ;;  %v555_v28 = vpop.f32.mrf.mxu1 }
 0x204   :  { %v634_v63 = vpack.c.bf16 %v545_v61, %v545_v61  ;;  %v638_v0 = vpack.c.bf16 %v555_v28, %v555_v28 }
 0x206   :  { %v719_v1 = vunpack.c.l.b16 %v634_v63  ;;  %v678_v2 = vunpack.c.l.b16 %v638_v0  ;;  %v2227_v0 = vld [vmem:[%s2875_s4 + $0x28] sm:$0xff] }
 0x208   :  { %v722_v3 = vpack.c.b16 %v719_v1, %v718_v62  ;;  %v681_v47 = vpack.c.b16 %v678_v2, %v677_v37  ;;  %v2221_v37 = vld [vmem:[%s2874_s3 + $0x88] sm:$0xff] }
 0x20a   :  { %1964 = vmatmul.msk.bf16.vlgmr.msra.gmra.mxu2 %vm189_vm1, %v681_v47  ;;  %1970 = vmatmul.msk.bf16.vlgmr.msra.gmra.mxu3 %vm189_vm1, %v722_v3 }
 0x20b   :  { %v548_v24 = vpop.f32.mrf.mxu0  ;;  %v558_v10 = vpop.f32.mrf.mxu1  ;;  %880 = vmatpush.bf16.msra.mxu2 %v2226_v54  ;;  %927 = vmatpush.bf16.msra.mxu3 %v2227_v0 }
 0x20c   :  { %v635_v57 = vpack.c.bf16 %v548_v24, %v548_v24  ;;  %v639_v6 = vpack.c.bf16 %v558_v10, %v558_v10 }
 0x20e   :  { %597 = vmatmul.bf16.gmra.mxu1 %v2215_v23  ;;  %v720_v29 = vunpack.c.l.b16 %v635_v57  ;;  %v679_v27 = vunpack.c.l.b16 %v639_v6 }
 0x213   :  { %v550_v12 = vpop.f32.mrf.mxu0  ;;  %v560_v13 = vpop.f32.mrf.mxu1 }
 0x214   :  { %v636_v15 = vpack.c.bf16 %v550_v12, %v550_v12  ;;  %v640_v26 = vpack.c.bf16 %v560_v13, %v560_v13 }
 0x216   :  { %v721_v25 = vunpack.c.l.b16 %v636_v15  ;;  %v680_v14 = vunpack.c.l.b16 %v640_v26  ;;  %v2228_v26 = vld [vmem:[%s2875_s4 + $0x30] sm:$0xff] }
 0x218   :  { %v723_v11 = vpack.c.b16 %v721_v25, %v720_v29  ;;  %v682_v30 = vpack.c.b16 %v680_v14, %v679_v27 }
 0x21a   :  { %1965 = vmatmul.msk.bf16.gmra.mxu2 %vm189_vm1, %v682_v30  ;;  %1971 = vmatmul.msk.bf16.gmra.mxu3 %vm189_vm1, %v723_v11 }
 0x21b   :  { %v563_v32 = vpop.f32.mrf.mxu1 }
 0x21c   :  { %v641_v9 = vpack.c.bf16 %v563_v32, %v563_v32 }
 0x21e   :  { %602 = vmatmul.bf16.gmra.mxu1 %v2216_v31  ;;  %v761_v22 = vunpack.c.l.b16 %v641_v9 }
 0x223   :  { %v565_v33 = vpop.f32.mrf.mxu1 }
 0x224   :  { %v642_v34 = vpack.c.bf16 %v565_v33, %v565_v33 }
 0x226   :  { %v762_v16 = vunpack.c.l.b16 %v642_v34 }
 0x228   :  { %v765_v36 = vpack.c.b16 %v762_v16, %v761_v22 }
 0x22a   :  { %1976 = vmatmul.msk.bf16.vlgmr.msrb.gmra.mxu2 %vm189_vm1, %v765_v36 }
 0x22b   :  { %v568_v18 = vpop.f32.mrf.mxu1  ;;  %974 = vmatpush.bf16.msrb.mxu2 %v2228_v26 }
 0x22c   :  { %v643_v7 = vpack.c.bf16 %v568_v18, %v568_v18 }
 0x22e   :  { %607 = vmatmul.bf16.gmra.mxu1 %v2217_v41  ;;  %v763_v43 = vunpack.c.l.b16 %v643_v7 }
 0x233   :  { %v570_v8 = vpop.f32.mrf.mxu1 }
 0x234   :  { %v644_v17 = vpack.c.bf16 %v570_v8, %v570_v8 }
 0x236   :  { %v764_v44 = vunpack.c.l.b16 %v644_v17 }
 0x238   :  { %v766_v19 = vpack.c.b16 %v764_v44, %v763_v43 }
 0x23a   :  { %1977 = vmatmul.msk.bf16.gmra.mxu2 %vm189_vm1, %v766_v19 }
 0x23b   :  { %v573_v48 = vpop.f32.mrf.mxu1 }
 0x23c   :  { %v645_v50 = vpack.c.bf16 %v573_v48, %v573_v48  ;;  %v2229_v48 = vld [vmem:[%s2875_s4 + $0x38] sm:$0xff] }
 0x23e   :  { %612 = vmatmul.bf16.gmra.mxu1 %v2218_v46  ;;  %v808_v20 = vunpack.c.l.b16 %v645_v50 }
 0x243   :  { %v575_v38 = vpop.f32.mrf.mxu1 }
 0x244   :  { %v646_v51 = vpack.c.bf16 %v575_v38, %v575_v38 }
 0x246   :  { %v809_v40 = vunpack.c.l.b16 %v646_v51 }
 0x248   :  { %v812_v53 = vpack.c.b16 %v809_v40, %v808_v20 }
 0x24a   :  { %1982 = vmatmul.msk.bf16.vlgmr.msrb.gmra.mxu3 %vm189_vm1, %v812_v53 }
 0x24b   :  { %v578_v49 = vpop.f32.mrf.mxu1  ;;  %1021 = vmatpush.bf16.msrb.mxu3 %v2229_v48 }
 0x24c   :  { %v647_v42 = vpack.c.bf16 %v578_v49, %v578_v49 }
 0x24e   :  { %617 = vmatmul.bf16.gmra.mxu1 %v2219_v55  ;;  %v810_v45 = vunpack.c.l.b16 %v647_v42 }
 0x253   :  { %v580_v35 = vpop.f32.mrf.mxu1 }
 0x254   :  { %v648_v39 = vpack.c.bf16 %v580_v35, %v580_v35 }
 0x256   :  { %v811_v52 = vunpack.c.l.b16 %v648_v39 }
 0x258   :  { %v813_v21 = vpack.c.b16 %v811_v52, %v810_v45 }
 0x25a   :  { %1983 = vmatmul.msk.bf16.gmra.mxu3 %vm189_vm1, %v813_v21 }
 0x25b   :  { %v583_v58 = vpop.f32.mrf.mxu1 }
 0x25c   :  { %v649_v59 = vpack.c.bf16 %v583_v58, %v583_v58 }
 0x25e   :  { %622 = vmatmul.bf16.gmra.mxu1 %v2220_v56  ;;  %v855_v28 = vunpack.c.l.b16 %v649_v59 }
 0x263   :  { %v585_v60 = vpop.f32.mrf.mxu1 }
 0x264   :  { %v650_v61 = vpack.c.bf16 %v585_v60, %v585_v60 }
 0x266   :  { %v856_v62 = vunpack.c.l.b16 %v650_v61 }
 0x268   :  { %v859_v63 = vpack.c.b16 %v856_v62, %v855_v28  ;;  %v2230_v28 = vld [vmem:[%s2875_s4 + $0x40] sm:$0xff] }
 0x26a   :  { %1988 = vmatmul.msk.bf16.vlgmr.msra.gmra.mxu2 %vm189_vm1, %v859_v63 }
 0x26b   :  { %v588_v1 = vpop.f32.mrf.mxu1  ;;  %1068 = vmatpush.bf16.msra.mxu2 %v2230_v28 }
 0x26c   :  { %v651_v2 = vpack.c.bf16 %v588_v1, %v588_v1 }
 0x26e   :  { %627 = vmatmul.bf16.gmra.mxu1 %v2221_v37  ;;  %v857_v5 = vunpack.c.l.b16 %v651_v2 }
 0x273   :  { %v590_v3 = vpop.f32.mrf.mxu1 }
 0x274   :  { %v652_v47 = vpack.c.bf16 %v590_v3, %v590_v3 }
 0x276   :  { %v858_v23 = vunpack.c.l.b16 %v652_v47 }
 0x278   :  { %v860_v24 = vpack.c.b16 %v858_v23, %v857_v5 }
 0x27a   :  { %1989 = vmatmul.msk.bf16.gmra.mxu2 %vm189_vm1, %v860_v24 }
 0x27b   :  { %v593_v10 = vpop.f32.mrf.mxu1 }
 0x27c   :  { %v653_v57 = vpack.c.bf16 %v593_v10, %v593_v10 }
 0x27e   :  { %v902_v13 = vunpack.c.l.b16 %v653_v57 }
 0x283   :  { %v595_v6 = vpop.f32.mrf.mxu1 }
 0x284   :  { %v654_v12 = vpack.c.bf16 %v595_v6, %v595_v6 }
 0x286   :  { %v903_v29 = vunpack.c.l.b16 %v654_v12 }
 0x288   :  { %v906_v15 = vpack.c.b16 %v903_v29, %v902_v13 }
 0x28a   :  { %1994 = vmatmul.msk.bf16.vlgmr.msra.gmra.mxu3 %vm189_vm1, %v906_v15 }
 0x28b   :  { %v598_v27 = vpop.f32.mrf.mxu1 }
 0x28c   :  { %v655_v30 = vpack.c.bf16 %v598_v27, %v598_v27 }
 0x28d   :  { %v704_v25 = vpop.f32.mrf.mxu2  ;;  %v745_v14 = vpop.f32.mrf.mxu3 }
 0x28e   :  { %v746_v11 = vadd.f32 %v745_v14, %v704_v25  ;;  %v904_v34 = vunpack.c.l.b16 %v655_v30 }
 0x293   :  { %v600_v31 = vpop.f32.mrf.mxu1 }
 0x294   :  { %v656_v32 = vpack.c.bf16 %v600_v31, %v600_v31 }
 0x295   :  { %v2676_v9 = vpop.f32.mrf.mxu2  ;;  %v2678_v33 = vpop.f32.mrf.mxu3 }
 0x296   :  { %v905_v22 = vunpack.c.l.b16 %v656_v32 }
 0x298   :  { %v907_v16 = vpack.c.b16 %v905_v22, %v904_v34 }
 0x29a   :  { %1995 = vmatmul.msk.bf16.gmra.mxu3 %vm189_vm1, %v907_v16 }
 0x29b   :  { %v603_v36 = vpop.f32.mrf.mxu1 }
 0x29c   :  { %v657_v7 = vpack.c.bf16 %v603_v36, %v603_v36 }
 0x29d   :  { %v709_v4 = vpop.f32.mrf.mxu2  ;;  %v750_v41 = vpop.f32.mrf.mxu3 }
 0x29e   :  { %v751_v18 = vadd.f32 %v750_v41, %v709_v4  ;;  %v949_v44 = vunpack.c.l.b16 %v657_v7 }
 0x2a3   :  { %v605_v8 = vpop.f32.mrf.mxu1 }
 0x2a4   :  { %v658_v17 = vpack.c.bf16 %v605_v8, %v605_v8 }
 0x2a5   :  { %v2681_v43 = vpop.f32.mrf.mxu2  ;;  %v2692_v58 = vpop.f32.mrf.mxu3 }
 0x2a6   :  { %v950_v19 = vunpack.c.l.b16 %v658_v17 }
 0x2a8   :  { %v953_v46 = vpack.c.b16 %v950_v19, %v949_v44 }
 0x2aa   :  { %2000 = vmatmul.msk.bf16.vlgmr.msrb.gmra.mxu2 %vm189_vm1, %v953_v46 }
 0x2ab   :  { %v608_v50 = vpop.f32.mrf.mxu1 }
 0x2ac   :  { %v659_v20 = vpack.c.bf16 %v608_v50, %v608_v50 }
 0x2ad   :  { %v788_v38 = vpop.f32.mrf.mxu2 }
 0x2ae   :  { %v798_v51 = vadd.f32 %v788_v38, %v746_v11  ;;  %v951_v55 = vunpack.c.l.b16 %v659_v20  ;;  %v748_v38 = vadd.f32 %v2678_v33, %v2676_v9  ;;  %v753_v9 = vadd.f32 %v2692_v58, %v2681_v43 }
 0x2b3   :  { %v610_v40 = vpop.f32.mrf.mxu1 }
 0x2b4   :  { %v660_v53 = vpack.c.bf16 %v610_v40, %v610_v40 }
 0x2b5   :  { %v2687_v54 = vpop.f32.mrf.mxu2 }
 0x2b6   :  { %v952_v49 = vunpack.c.l.b16 %v660_v53 }
 0x2b8   :  { %v954_v42 = vpack.c.b16 %v952_v49, %v951_v55 }
 0x2ba   :  { %2001 = vmatmul.msk.bf16.gmra.mxu2 %vm189_vm1, %v954_v42 }
 0x2bb   :  { %v613_v35 = vpop.f32.mrf.mxu1 }
 0x2bc   :  { %v661_v52 = vpack.c.bf16 %v613_v35, %v613_v35 }
 0x2bd   :  { %v793_v39 = vpop.f32.mrf.mxu2 }
 0x2be   :  { %v2690_v45 = vadd.f32 %v793_v39, %v751_v18  ;;  %v996_v59 = vunpack.c.l.b16 %v661_v52 }
 0x2c3   :  { %v615_v21 = vpop.f32.mrf.mxu1 }
 0x2c4   :  { %v662_v56 = vpack.c.bf16 %v615_v21, %v615_v21 }
 0x2c5   :  { %v795_v6 = vpop.f32.mrf.mxu2 }
 0x2c6   :  { %v997_v60 = vunpack.c.l.b16 %v662_v56 }
 0x2c8   :  { %v1000_v61 = vpack.c.b16 %v997_v60, %v996_v59 }
 0x2ca   :  { %2006 = vmatmul.msk.bf16.vlgmr.msrb.gmra.mxu3 %vm189_vm1, %v1000_v61 }
 0x2cb   :  { %v618_v62 = vpop.f32.mrf.mxu1 }
 0x2cc   :  { %v663_v37 = vpack.c.bf16 %v618_v62, %v618_v62 }
 0x2cd   :  { %v835_v63 = vpop.f32.mrf.mxu3 }
 0x2ce   :  { %v845_v0 = vadd.f32 %v835_v63, %v798_v51  ;;  %v998_v3 = vunpack.c.l.b16 %v663_v37  ;;  %v799_v51 = vadd.f32 %v2687_v54, %v748_v38  ;;  %v801_v37 = vadd.f32 %v795_v6, %v753_v9  ;;  %v1084_v9 = vld [vmem:[%s2876_s5] sm:$0x3] }
 0x2d3   :  { %v620_v1 = vpop.f32.mrf.mxu1 }
 0x2d4   :  { %v664_v2 = vpack.c.bf16 %v620_v1, %v620_v1 }
 0x2d5   :  { %v837_v34 = vpop.f32.mrf.mxu3 }
 0x2d6   :  { %v999_v47 = vunpack.c.l.b16 %v664_v2  ;;  %v846_v20 = vadd.f32 %v837_v34, %v799_v51  ;;  %v2296_v2 = vmov 32.0  }
 0x2d7   :  { %2287 = vrcp.f32 %v2296_v2 }
 0x2d8   :  { %v1001_v5 = vpack.c.b16 %v999_v47, %v998_v3 }
 0x2da   :  { %2007 = vmatmul.msk.bf16.gmra.mxu3 %vm189_vm1, %v1001_v5 }
 0x2db   :  { %v623_v23 = vpop.f32.mrf.mxu1 }
 0x2dc   :  { %v665_v24 = vpack.c.bf16 %v623_v23, %v623_v23 }
 0x2dd   :  { %v840_v22 = vpop.f32.mrf.mxu3  ;;  %v2288_v43 = vpop.eup %2287 }
 0x2de   :  { %v1043_v12 = vunpack.c.l.b16 %v665_v24  ;;  %v847_v21 = vadd.f32 %v840_v22, %v2690_v45  ;;  %vm1103_vm6 = vweird.f32 %v2288_v43 }
 0x2e3   :  { %v625_v10 = vpop.f32.mrf.mxu1 }
 0x2e4   :  { %v666_v57 = vpack.c.bf16 %v625_v10, %v625_v10 }
 0x2e5   :  { %v842_v36 = vpop.f32.mrf.mxu3 }
 0x2e6   :  { %v1044_v13 = vunpack.c.l.b16 %v666_v57  ;;  %v848_v45 = vadd.f32 %v842_v36, %v801_v37 }
 0x2e8   :  { %v1047_v29 = vpack.c.b16 %v1044_v13, %v1043_v12 }
 0x2ea   :  { %2012 = vmatmul.msk.bf16.vlgmr.msra.gmra.mxu2 %vm189_vm1, %v1047_v29  ;;  %v1099_v29 = vmul.f32 32.0, %v2288_v43 }
 0x2eb   :  { %v628_v15 = vpop.f32.mrf.mxu1 }
 0x2ec   :  { %v667_v25 = vpack.c.bf16 %v628_v15, %v628_v15 }
 0x2ed   :  { %v882_v26 = vpop.f32.mrf.mxu2 }
 0x2ee   :  { %v892_v27 = vadd.f32 %v882_v26, %v845_v0  ;;  %v1045_v30 = vunpack.c.l.b16 %v667_v25 }
 0x2f3   :  { %v630_v14 = vpop.f32.mrf.mxu1 }
 0x2f4   :  { %v668_v11 = vpack.c.bf16 %v630_v14, %v630_v14 }
 0x2f5   :  { %v884_v16 = vpop.f32.mrf.mxu2 }
 0x2f6   :  { %v1046_v31 = vunpack.c.l.b16 %v668_v11  ;;  %v893_v55 = vadd.f32 %v884_v16, %v846_v20 }
 0x2f8   :  { %v1048_v32 = vpack.c.b16 %v1046_v31, %v1045_v30 }
 0x2fa   :  { %2013 = vmatmul.msk.bf16.gmra.mxu2 %vm189_vm1, %v1048_v32  ;;  %vm1602_vm1 = vcmask 64512  }
 0x2fd   :  { %v887_v4 = vpop.f32.mrf.mxu2 }
 0x2fe   :  { %v894_v61 = vadd.f32 %v887_v4, %v847_v21 }
 0x305   :  { %v889_v18 = vpop.f32.mrf.mxu2 }
 0x306   :  { %v895_v5 = vadd.f32 %v889_v18, %v848_v45 }
 0x30d   :  { %v929_v41 = vpop.f32.mrf.mxu3 }
 0x30e   :  { %v939_v49 = vadd.f32 %v929_v41, %v892_v27  ;;  %v1100_v27 = vsub.f32 1.0, %v1099_v29 }
 0x310   :  { %v1101_v11 = vmul.f32 %v2288_v43, %v1100_v27  ;;  %v2232_v27 = vld [vmem:[%s2877_s6 + $0x8] sm:$0xff] }
 0x312   :  { %v1102_v32 = vadd.f32 %v2288_v43, %v1101_v11  ;;  %v1167_v11 = vld [vmem:[%s2877_s6 + $0x20] sm:$0xf] }
 0x314   :  { %v1104_v16 = vsel %vm1103_vm6, %v2288_v43, %v1102_v32  ;;  %v2238_v32 = vld [vmem:[%s2878_s7 + $0x18] sm:$0xff] }
 0x315   :  { %v931_v7 = vpop.f32.mrf.mxu3  ;;  %1277 = vmatpush.bf16.msra.mxu0 %v2238_v32 }
 0x316   :  { %v940_v42 = vadd.f32 %v931_v7, %v893_v55 }
 0x31d   :  { %v934_v17 = vpop.f32.mrf.mxu3 }
 0x31e   :  { %v941_v54 = vadd.f32 %v934_v17, %v894_v61 }
 0x325   :  { %v936_v19 = vpop.f32.mrf.mxu3 }
 0x326   :  { %v942_v24 = vadd.f32 %v936_v19, %v895_v5 }
 0x32d   :  { %v976_v8 = vpop.f32.mrf.mxu2 }
 0x32e   :  { %v986_v35 = vadd.f32 %v976_v8, %v939_v49 }
 0x335   :  { %v978_v44 = vpop.f32.mrf.mxu2 }
 0x336   :  { %v987_v39 = vadd.f32 %v978_v44, %v940_v42 }
 0x33d   :  { %v981_v46 = vpop.f32.mrf.mxu2 }
 0x33e   :  { %v988_v1 = vadd.f32 %v981_v46, %v941_v54 }
 0x345   :  { %v983_v50 = vpop.f32.mrf.mxu2 }
 0x346   :  { %v989_v12 = vadd.f32 %v983_v50, %v942_v24 }
 0x34d   :  { %v1023_v48 = vpop.f32.mrf.mxu3 }
 0x34e   :  { %v1033_v52 = vadd.f32 %v1023_v48, %v986_v35 }
 0x355   :  { %v1025_v40 = vpop.f32.mrf.mxu3 }
 0x356   :  { %v1034_v56 = vadd.f32 %v1025_v40, %v987_v39 }
 0x35d   :  { %v1028_v33 = vpop.f32.mrf.mxu3 }
 0x35e   :  { %v1035_v3 = vadd.f32 %v1028_v33, %v988_v1 }
 0x365   :  { %v1030_v58 = vpop.f32.mrf.mxu3 }
 0x366   :  { %v1036_v13 = vadd.f32 %v1030_v58, %v989_v12 }
 0x36d   :  { %v1070_v53 = vpop.f32.mrf.mxu2 }
 0x36e   :  { %v1080_v59 = vadd.f32 %v1070_v53, %v1033_v52 }
 0x370   :  { %v1085_v62 = vsel %vm114_vm0, %v1080_v59, 0.0 }
 0x375   :  { %v1072_v60 = vpop.f32.mrf.mxu2 }
 0x376   :  { %v1081_v28 = vadd.f32 %v1072_v60, %v1034_v56 }
 0x378   :  { %v1086_v63 = vsel %vm114_vm0, %v1081_v28, 0.0 }
 0x379   :  { %v1087_v0 = vadd.f32 %v1086_v63, %v1085_v62  ;;  %v1143_v62 = vperm.slane %v1084_v9, 0 }
 0x37d   :  { %v1075_v47 = vpop.f32.mrf.mxu2 }
 0x37e   :  { %v1082_v23 = vadd.f32 %v1075_v47, %v1035_v3 }
 0x380   :  { %v1088_v10 = vsel %vm114_vm0, %v1082_v23, 0.0 }
 0x381   :  { %v1089_v57 = vadd.f32 %v1088_v10, %v1087_v0  ;;  %v1148_v0 = vperm.slane %v1084_v9, 1 }
 0x385   :  { %v1077_v15 = vpop.f32.mrf.mxu2 }
 0x386   :  { %v1083_v26 = vadd.f32 %v1077_v15, %v1036_v13 }
 0x388   :  { %v1090_v6 = vsel %vm114_vm0, %v1083_v26, 0.0 }
 0x389   :  { %v1091_v25 = vadd.f32 %v1090_v6, %v1089_v57  ;;  %v2231_v6 = vld [vmem:[%s2877_s6] sm:$0xff] }
 0x38b   :  { %v1092_v14 = vrot.slane %v1091_v25, 4 }
 0x38d   :  { %v1093_v30 = vadd.f32 %v1092_v14, %v1091_v25  ;;  %v2233_v25 = vld [vmem:[%s2877_s6 + $0x10] sm:$0xff]  ;;  %v2234_v14 = vld [vmem:[%s2877_s6 + $0x18] sm:$0xff] }
 0x38f   :  { %v1094_v31 = vrot.slane %v1093_v30, 2 }
 0x391   :  { %v1095_v34 = vadd.f32 %v1094_v31, %v1093_v30  ;;  %v1185_v30 = vunpack.c.l.b16 %v1167_v11 }
 0x393   :  { %v1096_v22 = vrot.slane %v1095_v34, 1  ;;  %v1190_v31 = vpack.c.b16 %v1185_v30, %v1185_v30 }
 0x395   :  { %v1097_v36 = vadd.f32 %v1096_v22, %v1095_v34  ;;  %v2237_v34 = vld [vmem:[%s2878_s7 + $0x10] sm:$0xff]  ;;  %v2240_v22 = vld [vmem:[%s2878_s7 + $0x28] sm:$0xff] }
 0x396   :  { %1278 = vmatpush.bf16.msra.mxu0 %v2237_v34  ;;  %1337 = vmatpush.bf16.msrb.mxu2 %v2240_v22 }
 0x397   :  { %v1105_v4 = vmul.f32 %v1104_v16, %v1097_v36  ;;  %v2236_v36 = vld [vmem:[%s2878_s7 + $0x8] sm:$0xff] }
 0x399   :  { %v1106_v41 = vsub.f32 %v1080_v59, %v1105_v4  ;;  %v1107_v18 = vsub.f32 %v1081_v28, %v1105_v4  ;;  %v1108_v7 = vsub.f32 %v1082_v23, %v1105_v4  ;;  %v1109_v8 = vsub.f32 %v1083_v26, %v1105_v4  ;;  %v2235_v4 = vld [vmem:[%s2878_s7] sm:$0xff] }
 0x39a   :  { %1305 = vmatpush.bf16.msrb.mxu0 %v2236_v36 }
 0x39b   :  { %v1110_v17 = vmul.f32 %v1106_v41, %v1106_v41  ;;  %v1111_v44 = vmul.f32 %v1107_v18, %v1107_v18  ;;  %v1112_v19 = vmul.f32 %v1108_v7, %v1108_v7  ;;  %v1113_v46 = vmul.f32 %v1109_v8, %v1109_v8 }
 0x39d   :  { %v1114_v48 = vsel %vm114_vm0, %v1110_v17, 0.0  ;;  %v1115_v50 = vsel %vm114_vm0, %v1111_v44, 0.0  ;;  %v1117_v51 = vsel %vm114_vm0, %v1112_v19, 0.0  ;;  %v1119_v40 = vsel %vm114_vm0, %v1113_v46, 0.0  ;;  %v2242_v17 = vld [vmem:[%s2878_s7 + $0x38] sm:$0xff]  ;;  %v2241_v19 = vld [vmem:[%s2878_s7 + $0x30] sm:$0xff] }
 0x39e   :  { %v1116_v38 = vadd.f32 %v1115_v50, %v1114_v48  ;;  %1306 = vmatpush.bf16.msrb.mxu0 %v2235_v4  ;;  %v2248_v48 = vld [vmem:[%s2878_s7 + $0x68] sm:$0xff] }
 0x3a0   :  { %v1118_v20 = vadd.f32 %v1117_v51, %v1116_v38  ;;  %v2247_v38 = vld [vmem:[%s2878_s7 + $0x60] sm:$0xff] }
 0x3a2   :  { %v1120_v53 = vadd.f32 %v1119_v40, %v1118_v20  ;;  %v2246_v20 = vld [vmem:[%s2878_s7 + $0x58] sm:$0xff] }
 0x3a4   :  { %v1121_v55 = vrot.slane %v1120_v53, 4 }
 0x3a6   :  { %v1122_v49 = vadd.f32 %v1121_v55, %v1120_v53  ;;  %v2245_v53 = vld [vmem:[%s2878_s7 + $0x50] sm:$0xff] }
 0x3a8   :  { %v1123_v42 = vrot.slane %v1122_v49, 2 }
 0x3aa   :  { %v1124_v35 = vadd.f32 %v1123_v42, %v1122_v49  ;;  %v2252_v49 = vld [vmem:[%s2878_s7 + $0x88] sm:$0xff] }
 0x3ac   :  { %v1125_v39 = vrot.slane %v1124_v35, 1 }
 0x3ae   :  { %v1126_v52 = vadd.f32 %v1125_v39, %v1124_v35  ;;  %v2251_v35 = vld [vmem:[%s2878_s7 + $0x80] sm:$0xff] }
 0x3b0   :  { %v1127_v21 = vmul.f32 %v1126_v52, %v1104_v16  ;;  %v2239_v16 = vld [vmem:[%s2878_s7 + $0x20] sm:$0xff]  ;;  %v2250_v52 = vld [vmem:[%s2878_s7 + $0x78] sm:$0xff] }
 0x3b1   :  { %1338 = vmatpush.bf16.msrb.mxu2 %v2239_v16 }
 0x3b2   :  { %v1128_v56 = vadd.f32 1e-05, %v1127_v21 }
 0x3b4   :  { %2289 = vrsqrt.f32 %v1128_v56  ;;  %vm1135_vm8 = vweird.f32 %v1128_v56 }
 0x3ba   :  { %v2290_v59 = vpop.eup %2289 }
 0x3bb   :  { %v1130_v60 = vmul.f32 %v2290_v59, %v1128_v56  ;;  %vm1136_vm7 = vweird.f32 %v2290_v59  ;;  %v2249_v56 = vld [vmem:[%s2878_s7 + $0x70] sm:$0xff] }
 0x3bc   :  { %vm1137_vm9 = vmor %vm1135_vm8, %vm1136_vm7 }
 0x3bd   :  { %v1131_v61 = vmul.f32 %v2290_v59, %v1130_v60 }
 0x3bf   :  { %v1132_v28 = vmul.f32 0.5, %v1131_v61 }
 0x3c1   :  { %v1133_v33 = vsub.f32 1.5, %v1132_v28 }
 0x3c3   :  { %v1134_v54 = vmul.f32 %v2290_v59, %v1133_v33 }
 0x3c5   :  { %v1138_v63 = vsel %vm1137_vm9, %v2290_v59, %v1134_v54 }
 0x3c6   :  { %v1141_v37 = vmul.f32 %v1138_v63, %v1108_v7  ;;  %v1142_v1 = vmul.f32 %v1138_v63, %v1109_v8  ;;  %v1139_v2 = vmul.f32 %v1138_v63, %v1106_v41  ;;  %v1140_v45 = vmul.f32 %v1138_v63, %v1107_v18  ;;  %v2244_v41 = vld [vmem:[%s2878_s7 + $0x48] sm:$0xff]  ;;  %v2243_v7 = vld [vmem:[%s2878_s7 + $0x40] sm:$0xff] }
 0x3c7   :  { %1403 = vmatpush.bf16.msra.mxu2 %v2244_v41 }
 0x3c8   :  { %v1147_v3 = vmul.f32 %v1143_v62, %v1142_v1  ;;  %v1146_v47 = vmul.f32 %v1143_v62, %v1141_v37  ;;  %v1144_v5 = vmul.f32 %v1143_v62, %v1139_v2  ;;  %v1145_v23 = vmul.f32 %v1143_v62, %v1140_v45 }
 0x3ca   :  { %v1152_v24 = vadd.f32 %v1148_v0, %v1147_v3  ;;  %v1151_v10 = vadd.f32 %v1148_v0, %v1146_v47  ;;  %v1149_v43 = vadd.f32 %v1148_v0, %v1144_v5  ;;  %v1150_v58 = vadd.f32 %v1148_v0, %v1145_v23 }
 0x3cb   :  { %1404 = vmatpush.bf16.msra.mxu2 %v2243_v7 }
 0x3cc   :  { %v1156_v57 = vmax.f32 %v1152_v24, 0.0  ;;  %v1155_v12 = vmax.f32 %v1151_v10, 0.0  ;;  %v1153_v13 = vmax.f32 %v1149_v43, 0.0  ;;  %v1154_v29 = vmax.f32 %v1150_v58, 0.0 }
 0x3ce   :  { %v1158_v15 = vpack.c.bf16 %v1156_v57, %v1155_v12  ;;  %v1157_v26 = vpack.c.bf16 %v1154_v29, %v1153_v13  ;;  %v2297_v13 = vmov 8.0  }
 0x3cf   :  { %2291 = vrcp.f32 %v2297_v13  ;;  %v2269_v13 = vld [vmem:[%s2880_s10 + $0x70] sm:$0xff] }
 0x3d0   :  { %1212 = vmatpush.bf16.msra.mxu3 %v1158_v15 }
 0x3d4   :  { %1213 = vmatpush.bf16.msra.mxu3 %v1157_v26 }
 0x3d7   :  { %2030 = vmatmul.msk.bf16.vlgmr.msra.gmra.mxu3 %vm114_vm0, %v2231_v6  ;;  %v2292_v6 = vpop.eup %2291 }
 0x3d8   :  { %vm1557_vm11 = vweird.f32 %v2292_v6 }
 0x3e7   :  { %2031 = vmatmul.msk.bf16.gmra.mxu3 %vm114_vm0, %v2232_v27 }
 0x3f7   :  { %2032 = vmatmul.msk.bf16.gmra.mxu3 %vm114_vm0, %v2233_v25 }
 0x407   :  { %2033 = vmatmul.msk.bf16.gmra.mxu3 %vm114_vm0, %v2234_v14  ;;  %v1553_v14 = vmul.f32 8.0, %v2292_v6 }
 0x409   :  { %v1554_v32 = vsub.f32 1.0, %v1553_v14 }
 0x40b   :  { %v1555_v36 = vmul.f32 %v2292_v6, %v1554_v32 }
 0x40d   :  { %v1556_v7 = vadd.f32 %v2292_v6, %v1555_v36 }
 0x417   :  { %2034 = vmatmul.msk.bf16.gmra.mxu3 %vm114_vm0, %v1190_v31 }
 0x45a   :  { %v1215_v18 = vpop.f32.mrf.mxu3 }
 0x45b   :  { %v1239_v40 = vpack.c.bf16 %v1215_v18, %v1215_v18 }
 0x462   :  { %v1217_v8 = vpop.f32.mrf.mxu3 }
 0x463   :  { %v1240_v44 = vpack.c.bf16 %v1217_v8, %v1217_v8 }
 0x465   :  { %2043 = vmatmul.msk.bf16.vlgmr.msra.gmra.mxu0 %vm114_vm0, %v1240_v44  ;;  %v1558_v44 = vsel %vm1557_vm11, %v2292_v6, %v1556_v7  ;;  %v2267_v6 = vld [vmem:[%s2880_s10 + $0x60] sm:$0xff] }
 0x466   :  { %1370 = vmatpush.bf16.msra.mxu0 %v2242_v17 }
 0x46a   :  { %v1220_v46 = vpop.f32.mrf.mxu3  ;;  %1371 = vmatpush.bf16.msra.mxu0 %v2241_v19 }
 0x46b   :  { %v1241_v50 = vpack.c.bf16 %v1220_v46, %v1220_v46 }
 0x46d   :  { %2061 = vmatmul.msk.bf16.vlgmr.msrb.gmra.mxu2 %vm114_vm0, %v1241_v50 }
 0x46e   :  { %1469 = vmatpush.bf16.msrb.mxu2 %v2248_v48 }
 0x472   :  { %v1222_v51 = vpop.f32.mrf.mxu3  ;;  %1470 = vmatpush.bf16.msrb.mxu2 %v2247_v38 }
 0x473   :  { %v1242_v21 = vpack.c.bf16 %v1222_v51, %v1222_v51 }
 0x475   :  { %2052 = vmatmul.msk.bf16.vlgmr.msrb.gmra.mxu0 %vm114_vm0, %v1239_v40 }
 0x476   :  { %1436 = vmatpush.bf16.msrb.mxu0 %v2246_v20 }
 0x47a   :  { %v1225_v55 = vpop.f32.mrf.mxu3  ;;  %1437 = vmatpush.bf16.msrb.mxu0 %v2245_v53 }
 0x47b   :  { %v1243_v42 = vpack.c.bf16 %v1225_v55, %v1225_v55 }
 0x47d   :  { %2079 = vmatmul.msk.bf16.vlgmr.msra.gmra.mxu2 %vm114_vm0, %v1243_v42 }
 0x47e   :  { %1535 = vmatpush.bf16.msra.mxu2 %v2252_v49 }
 0x482   :  { %v1227_v39 = vpop.f32.mrf.mxu3  ;;  %1536 = vmatpush.bf16.msra.mxu2 %v2251_v35 }
 0x483   :  { %v1244_v28 = vpack.c.bf16 %v1227_v39, %v1227_v39 }
 0x485   :  { %2070 = vmatmul.msk.bf16.vlgmr.msra.gmra.mxu0 %vm114_vm0, %v1242_v21 }
 0x486   :  { %1502 = vmatpush.bf16.msra.mxu0 %v2250_v52 }
 0x48a   :  { %v1230_v59 = vpop.f32.mrf.mxu3  ;;  %1503 = vmatpush.bf16.msra.mxu0 %v2249_v56 }
 0x48b   :  { %v1245_v60 = vpack.c.bf16 %v1230_v59, %v1230_v59 }
 0x48d   :  { %2097 = vmatmul.msk.bf16.vlgmr.msrb.gmra.mxu2 %vm114_vm0, %v1245_v60  ;;  %v1543_v60 = vld [vmem:[%s2879_s8] sm:$0x3] }
 0x492   :  { %v1232_v61 = vpop.f32.mrf.mxu3 }
 0x493   :  { %v1246_v62 = vpack.c.bf16 %v1232_v61, %v1232_v61 }
 0x495   :  { %2088 = vmatmul.msk.bf16.vlgmr.msrb.gmra.mxu0 %vm114_vm0, %v1244_v28  ;;  %v1582_v28 = vperm.slane %v1543_v60, 0 }
 0x49a   :  { %v1235_v9 = vpop.f32.mrf.mxu3 }
 0x49b   :  { %v1247_v33 = vpack.c.bf16 %v1235_v9, %v1235_v9  ;;  %v2258_v9 = vld [vmem:[%s2880_s10 + $0x18] sm:$0xff] }
 0x49c   :  { %1723 = vmatpush.bf16.msrb.mxu2 %v2258_v9 }
 0x49d   :  { %2115 = vmatmul.msk.bf16.vlgmr.msra.gmra.mxu2 %vm114_vm0, %v1247_v33 }
 0x4a2   :  { %v1237_v54 = vpop.f32.mrf.mxu3 }
 0x4a5   :  { %2106 = vmatmul.msk.bf16.vlgmr.msra.gmra.mxu0 %vm114_vm0, %v1246_v62  ;;  %v1584_v62 = vperm.slane %v1543_v60, 1 }
 0x4e2   :  { %v1280_v63 = vpop.f32.mrf.mxu0 }
 0x4ea   :  { %v1282_v0 = vpop.f32.mrf.mxu0 }
 0x4f0   :  { %v1340_v37 = vpop.f32.mrf.mxu2 }
 0x4f2   :  { %v1308_v1 = vpop.f32.mrf.mxu0 }
 0x4f3   :  { %v1309_v10 = vadd.f32 %v1308_v1, %v1280_v63 }
 0x4f5   :  { %v1344_v58 = vadd.f32 %v1340_v37, %v1309_v10  ;;  %v2260_v10 = vld [vmem:[%s2880_s10 + $0x28] sm:$0xff] }
 0x4f8   :  { %v1342_v2 = vpop.f32.mrf.mxu2 }
 0x4fa   :  { %v1310_v45 = vpop.f32.mrf.mxu0 }
 0x4fb   :  { %v2253_v45 = vld [vmem:[%s2881_s9] sm:$0xff] }
 0x500   :  { %v1406_v3 = vpop.f32.mrf.mxu2 }
 0x502   :  { %v1373_v47 = vpop.f32.mrf.mxu0 }
 0x503   :  { %v1377_v57 = vadd.f32 %v1373_v47, %v1344_v58  ;;  %v2262_v47 = vld [vmem:[%s2880_s10 + $0x38] sm:$0xff] }
 0x504   :  { %1683 = vmatpush.bf16.msrb.mxu0 %v2262_v47  ;;  %v2270_v58 = vld [vmem:[%s2880_s10 + $0x78] sm:$0xff] }
 0x505   :  { %v1410_v15 = vadd.f32 %v1406_v3, %v1377_v57  ;;  %v2254_v3 = vld [vmem:[%s2881_s9 + $0x8] sm:$0xff]  ;;  %v2259_v57 = vld [vmem:[%s2880_s10 + $0x20] sm:$0xff] }
 0x508   :  { %v1408_v5 = vpop.f32.mrf.mxu2 }
 0x509   :  { %v2257_v5 = vld [vmem:[%s2880_s10 + $0x10] sm:$0xff] }
 0x50a   :  { %v1375_v23 = vpop.f32.mrf.mxu0  ;;  %1724 = vmatpush.bf16.msrb.mxu2 %v2257_v5 }
 0x50b   :  { %v2261_v23 = vld [vmem:[%s2880_s10 + $0x30] sm:$0xff] }
 0x50c   :  { %1684 = vmatpush.bf16.msrb.mxu0 %v2261_v23 }
 0x510   :  { %v1472_v24 = vpop.f32.mrf.mxu2  ;;  %1685 = vmatpush.bf16.msrb.mxu0 %v2260_v10 }
 0x512   :  { %v1439_v43 = vpop.f32.mrf.mxu0 }
 0x513   :  { %v1443_v26 = vadd.f32 %v1439_v43, %v1410_v15  ;;  %v2255_v43 = vld [vmem:[%s2880_s10] sm:$0xff]  ;;  %v2268_v15 = vld [vmem:[%s2880_s10 + $0x68] sm:$0xff] }
 0x514   :  { %1686 = vmatpush.bf16.msrb.mxu0 %v2259_v57 }
 0x515   :  { %v1476_v25 = vadd.f32 %v1472_v24, %v1443_v26  ;;  %v2256_v24 = vld [vmem:[%s2880_s10 + $0x8] sm:$0xff] }
 0x516   :  { %1725 = vmatpush.bf16.msrb.mxu2 %v2256_v24  ;;  %v2264_v26 = vld [vmem:[%s2880_s10 + $0x48] sm:$0xff] }
 0x518   :  { %v1474_v12 = vpop.f32.mrf.mxu2 }
 0x519   :  { %v2266_v12 = vld [vmem:[%s2880_s10 + $0x58] sm:$0xff] }
 0x51a   :  { %v1441_v29 = vpop.f32.mrf.mxu0  ;;  %1726 = vmatpush.bf16.msrb.mxu2 %v2255_v43  ;;  %1771 = vmatpush.bf16.msra.mxu0 %v2266_v12 }
 0x51b   :  { %v2265_v29 = vld [vmem:[%s2880_s10 + $0x50] sm:$0xff] }
 0x51e   :  { %1820 = vmatpush.bf16.msra.mxu2 %v2270_v58  ;;  %1772 = vmatpush.bf16.msra.mxu0 %v2265_v29 }
 0x520   :  { %v1538_v27 = vpop.f32.mrf.mxu2 }
 0x522   :  { %v1505_v11 = vpop.f32.mrf.mxu0  ;;  %1821 = vmatpush.bf16.msra.mxu2 %v2269_v13  ;;  %1773 = vmatpush.bf16.msra.mxu0 %v2264_v26 }
 0x523   :  { %v1509_v30 = vadd.f32 %v1505_v11, %v1476_v25 }
 0x525   :  { %v1542_v31 = vadd.f32 %v1538_v27, %v1509_v30  ;;  %v2263_v27 = vld [vmem:[%s2880_s10 + $0x40] sm:$0xff] }
 0x526   :  { %1822 = vmatpush.bf16.msra.mxu2 %v2268_v15  ;;  %1774 = vmatpush.bf16.msra.mxu0 %v2263_v27 }
 0x527   :  { %v1545_v34 = vsel %vm1544_vm10, %v1542_v31, 0.0 }
 0x528   :  { %v1546_v22 = vrot.slane %v1545_v34, 4  ;;  %v1540_v16 = vpop.f32.mrf.mxu2 }
 0x52a   :  { %v1547_v4 = vadd.f32 %v1546_v22, %v1545_v34  ;;  %v1507_v41 = vpop.f32.mrf.mxu0  ;;  %1823 = vmatpush.bf16.msra.mxu2 %v2267_v6 }
 0x52c   :  { %v1548_v18 = vrot.slane %v1547_v4, 2 }
 0x52e   :  { %v1549_v8 = vadd.f32 %v1548_v18, %v1547_v4 }
 0x530   :  { %v1550_v17 = vrot.slane %v1549_v8, 1 }
 0x532   :  { %v1551_v19 = vadd.f32 %v1550_v17, %v1549_v8  ;;  %v2282_v17 = vld [vmem:[%s2882_s11] ss:$0 sm:$0xff] }
 0x534   :  { %v1559_v46 = vmul.f32 %v1558_v44, %v1551_v19 }
 0x536   :  { %v1560_v48 = vsub.f32 %v1542_v31, %v1559_v46 }
 0x538   :  { %v1561_v50 = vmul.f32 %v1560_v48, %v1560_v48 }
 0x53a   :  { %v1562_v38 = vsel %vm1544_vm10, %v1561_v50, 0.0 }
 0x53b   :  { %v1563_v51 = vrot.slane %v1562_v38, 4 }
 0x53d   :  { %v1564_v20 = vadd.f32 %v1563_v51, %v1562_v38 }
 0x53f   :  { %v1565_v40 = vrot.slane %v1564_v20, 2 }
 0x541   :  { %v1566_v53 = vadd.f32 %v1565_v40, %v1564_v20 }
 0x543   :  { %v1567_v55 = vrot.slane %v1566_v53, 1 }
 0x545   :  { %v1568_v49 = vadd.f32 %v1567_v55, %v1566_v53 }
 0x547   :  { %v1569_v42 = vmul.f32 %v1568_v49, %v1558_v44 }
 0x549   :  { %v1570_v35 = vadd.f32 1e-05, %v1569_v42 }
 0x54b   :  { %2293 = vrsqrt.f32 %v1570_v35  ;;  %vm1577_vm13 = vweird.f32 %v1570_v35 }
 0x551   :  { %v2294_v39 = vpop.eup %2293 }
 0x552   :  { %v1572_v52 = vmul.f32 %v2294_v39, %v1570_v35  ;;  %vm1578_vm12 = vweird.f32 %v2294_v39 }
 0x553   :  { %vm1579_vm14 = vmor %vm1577_vm13, %vm1578_vm12 }
 0x554   :  { %v1573_v21 = vmul.f32 %v2294_v39, %v1572_v52 }
 0x556   :  { %v1574_v56 = vmul.f32 0.5, %v1573_v21 }
 0x558   :  { %v1575_v59 = vsub.f32 1.5, %v1574_v56 }
 0x55a   :  { %v1576_v61 = vmul.f32 %v2294_v39, %v1575_v59 }
 0x55c   :  { %v1580_v33 = vsel %vm1579_vm14, %v2294_v39, %v1576_v61 }
 0x55d   :  { %v1581_v54 = vmul.f32 %v1580_v33, %v1560_v48 }
 0x55f   :  { %v1583_v63 = vmul.f32 %v1582_v28, %v1581_v54 }
 0x561   :  { %v1585_v0 = vadd.f32 %v1584_v62, %v1583_v63 }
 0x563   :  { %v1586_v37 = vmax.f32 %v1585_v0, 0.0 }
 0x565   :  { %v1587_v1 = vpack.c.bf16 %v1586_v37, %v1586_v37 }
 0x567   :  { %v1611_v2 = vsel %vm1609_vm15, %v1587_v1, 0 }
 0x568   :  { %1620 = vmatpush.bf16.msrb.mxu3 %v1611_v2 }
 0x56b   :  { %2124 = vmatmul.msk.bf16.vlgmr.msrb.gmra.mxu3 %vm1602_vm1, %v2253_v45 }
 0x57b   :  { %2125 = vmatmul.msk.bf16.gmra.mxu3 %vm1602_vm1, %v2254_v3 }
 0x5ee   :  { %v1622_v25 = vpop.f32.mrf.mxu3 }
 0x5ef   :  { %v1632_v14 = vpack.c.bf16 %v1622_v25, %v1622_v25 }
 0x5f1   :  { %2159 = vmatmul.msk.bf16.vlgmr.msrb.gmra.mxu2 %vm1544_vm10, %v1632_v14 }
 0x5f6   :  { %v1624_v11 = vpop.f32.mrf.mxu3 }
 0x5f7   :  { %v1633_v30 = vpack.c.bf16 %v1624_v11, %v1624_v11 }
 0x5f9   :  { %2142 = vmatmul.msk.bf16.vlgmr.msrb.gmra.mxu0 %vm1544_vm10, %v1633_v30 }
 0x5fe   :  { %v1627_v31 = vpop.f32.mrf.mxu3 }
 0x5ff   :  { %v1634_v34 = vpack.c.bf16 %v1627_v31, %v1627_v31 }
 0x606   :  { %v1629_v32 = vpop.f32.mrf.mxu3 }
 0x607   :  { %v1635_v22 = vpack.c.bf16 %v1629_v32, %v1629_v32 }
 0x609   :  { %2193 = vmatmul.msk.bf16.vlgmr.msra.gmra.mxu2 %vm1544_vm10, %v1635_v22  ;;  %2176 = vmatmul.msk.bf16.vlgmr.msra.gmra.mxu0 %vm1544_vm10, %v1634_v34 }
 0x674   :  { %v1728_v16 = vpop.f32.mrf.mxu2 }
 0x676   :  { %v1688_v36 = vpop.f32.mrf.mxu0 }
 0x677   :  { %v1729_v7 = vadd.f32 %v1728_v16, %v1688_v36 }
 0x67c   :  { %v1730_v4 = vpop.f32.mrf.mxu2 }
 0x67e   :  { %v1690_v41 = vpop.f32.mrf.mxu0 }
 0x686   :  { %v1776_v18 = vpop.f32.mrf.mxu0 }
 0x687   :  { %v1780_v8 = vadd.f32 %v1776_v18, %v1729_v7 }
 0x68c   :  { %v1825_v44 = vpop.f32.mrf.mxu2 }
 0x68d   :  { %v1829_v19 = vadd.f32 %v1825_v44, %v1780_v8 }
 0x68e   :  { %v1778_v46 = vpop.f32.mrf.mxu0 }
 0x68f   :  { %v1834_v48 = vadd.f32 %v2282_v17, %v1829_v19 }
 0x691   :  { %1835 = vst.msk [vmem:[%s2883_s12] sm:$0xff] %vm114_vm0, %v1834_v48 }
 0x694   :  { %v1827_v50 = vpop.f32.mrf.mxu2 }

</bundles_post_ra>
